<compile_context>
chip_gen: v7x
topology: tpu7x:2x2x1
jax: 0.10.0
libtpu: 0.0.40
codegen_flags: <defaults>
</compile_context>

<pallas_src>
import jax
import jax.numpy as jnp
from jax.experimental import pallas as pl
from jax.experimental.pallas import tpu as pltpu

NEG_INF = -1e30


def _round_up(x, m):
    return ((x + m - 1) // m) * m


def _make_kernel(lv, lq, lq_pad, lq_tile, d, matmul_dtype):
    nt = lq_pad // lq_tile
    has_pad = lq_pad != lq

    def kernel(vid_ref, q_ref, vmask_ref, qmask_ref, w1_ref, w2_ref, out_ref,
               m_sc, l_sc, acc_sc, a_sc):
        t = pl.program_id(1)

        v_raw = vid_ref[...]                               # (Lv, D) native dtype
        v_mm = v_raw.astype(matmul_dtype)
        w1q = w1_ref[d:2 * d, :]                           # (D, D) matmul_dtype (pre-cast)
        w1m = w1_ref[2 * d:3 * d, :]                       # (D, D)

        # ---- per-batch-element init (first query tile only) ----
        @pl.when(t == 0)
        def _():
            m_sc[...] = jnp.full(m_sc.shape, -jnp.inf, jnp.float32)
            l_sc[...] = jnp.zeros(l_sc.shape, jnp.float32)
            acc_sc[...] = jnp.zeros(acc_sc.shape, jnp.float32)
            # Query-independent term of the first Linear, hoisted out of the t loop.
            a_sc[...] = jnp.dot(v_mm, w1_ref[0:d, :],
                                preferred_element_type=jnp.float32)

        q_raw = q_ref[...]                                 # (T, D) native dtype
        q_mm = q_raw.astype(matmul_dtype)
        qm_t = qmask_ref[...].astype(jnp.float32)          # (1, T)
        vm = vmask_ref[...].astype(jnp.float32)            # (Lv, 1)

        # ---- sim(i, j) for this query tile ----
        b_t = jnp.dot(q_mm, w1q, preferred_element_type=jnp.float32)        # (T, D)
        cross = v_mm[:, None, :] * q_mm[None, :, :]                         # (Lv, T, D) bf16
        c = jnp.dot(cross.reshape(lv * lq_tile, d), w1m,
                    preferred_element_type=jnp.float32).reshape(lv, lq_tile, d)
        hidden = jnp.maximum(a_sc[...][:, None, :] + b_t[None, :, :] + c, 0.0)
        # Second Linear (D -> 1): VPU multiply + XLU lane reduce (layout-friendly).
        w2row = w2_ref[...].reshape(1, 1, d)
        sim = jnp.sum(hidden * w2row, axis=-1)                              # (Lv, T) f32

        # ---- mask_logits (additive, matches the PyTorch/JAX reference) ----
        masked = sim + (1.0 - vm * qm_t) * NEG_INF
        if has_pad:
            # Padded query columns rank strictly below real (even fully-masked)
            # columns so fully-masked video rows stay uniform over the real Lq only.
            col = jax.lax.broadcasted_iota(jnp.int32, (1, lq_tile), 1) + t * lq_tile
            masked = jnp.where(col < lq, masked, 2.0 * NEG_INF)

        # ---- online softmax update (all f32) ----
        m_prev = m_sc[...]
        m_new = jnp.maximum(m_prev, jnp.max(masked, axis=-1, keepdims=True))
        alpha = jnp.exp(m_prev - m_new)
        p = jnp.exp(masked - m_new)                                         # (Lv, T)
        l_sc[...] = alpha * l_sc[...] + jnp.sum(p, axis=-1, keepdims=True)
        acc_sc[...] = alpha * acc_sc[...] + jnp.dot(
            p, q_raw.astype(jnp.float32), preferred_element_type=jnp.float32)
        m_sc[...] = m_new

        # ---- finalize + write output (last query tile only) ----
        @pl.when(t == nt - 1)
        def _():
            v = v_raw.astype(jnp.float32)
            m = m_sc[...]
            v2q = acc_sc[...] / l_sc[...]                                   # exact divide
            # Q2V: the per-video-row max over queries is exactly the running max m.
            g = jnp.max(m, axis=0, keepdims=True)                           # (1, 1)
            p2 = jnp.exp(m - g)                                             # (Lv, 1)
            att_q2v = p2 / jnp.sum(p2, axis=0, keepdims=True)
            q2v = jnp.sum(att_q2v * v, axis=0, keepdims=True)               # (1, D)
            # Three direct lane-slice stores; no (Lv, 3D) concatenate temp.
            out_ref[:, 0:d] = v.astype(out_ref.dtype)
            out_ref[:, d:2 * d] = v2q.astype(out_ref.dtype)
            out_ref[:, 2 * d:3 * d] = (v * q2v).astype(out_ref.dtype)

    return kernel


def vqmma_pool(vid_feat, query_feat, vid_mask, query_mask, w1, w2,
               *, lq_tile=None, matmul_dtype=jnp.bfloat16, interpret=False):
    """Pallas TPU forward of VQMMApool.

    vid_feat: (B, Lv, D)   query_feat: (B, Lq, D)
    vid_mask: (B, Lv)      query_mask: (B, Lq)
    w1: (3D, D) = Linear(3D->D, bias=False).weight.T
    w2: (D, 1)  = Linear(D->1,  bias=False).weight.T
    returns (B, Lv, 3D) = cat([vid_feat, V2Q, vid_feat * Q2V], -1)
    """
    B, Lv, D = vid_feat.shape
    Lq = query_feat.shape[1]
    assert w1.shape == (3 * D, D) and w2.shape == (D, 1)
    f32 = jnp.float32
    in_bytes = jnp.dtype(vid_feat.dtype).itemsize
    out_dtype = vid_feat.dtype
    out_bytes = jnp.dtype(out_dtype).itemsize
    mm_bytes = jnp.dtype(matmul_dtype).itemsize

    # --- generation-aware VMEM budget (64 MiB on v7x, 128 MiB on v5e/v6e) ---
    try:
        phys_vmem = int(pltpu.get_tpu_info().vmem_capacity_bytes)
    except Exception:
        phys_vmem = 64 * 1024 * 1024
    vmem_cap = min((phys_vmem * 3) // 4, 100 * 1024 * 1024)   # leave compiler headroom

    # --- choose the query tile: large enough to fill the MXU K dim (prefer x128),
    #     small enough that (Lv, lq_tile, D) intermediates fit in half the budget ---
    lq_r8 = _round_up(Lq, 8)
    if lq_tile is None:
        per_elem = mm_bytes + 2 * 4 + 4           # cross (bf16/f32) + c + hidden + slack
        cand = (vmem_cap // 2) // max(1, per_elem * Lv * D)
        cand = int(max(8, min(cand, 512)))
        cand = (cand // 128) * 128 if cand >= 128 else (cand // 8) * 8
        lq_tile = min(cand, lq_r8)
    else:
        lq_tile = min(_round_up(int(lq_tile), 8), lq_r8)
    lq_pad = _round_up(Lq, lq_tile)
    nt = lq_pad // lq_tile

    # --- wrapper-side plumbing: big tensors stay at native dtype, masks are tiny ---
    q_in = query_feat if lq_pad == Lq else jnp.pad(
        query_feat, ((0, 0), (0, lq_pad - Lq), (0, 0)))
    qm_pad = query_mask.astype(f32)
    if lq_pad != Lq:
        qm_pad = jnp.pad(qm_pad, ((0, 0), (0, lq_pad - Lq)))
    qm_tiles = qm_pad.reshape(B, nt, 1, lq_tile)
    vm = vid_mask.astype(f32).reshape(B, Lv, 1)               # no in-kernel transpose
    w1_mm = w1.astype(matmul_dtype)                           # cast once, halves W1 DMA
    w2_row = w2.astype(f32).reshape(1, D)

    # --- VMEM limit: tight estimate (+30% headroom), clamped to the per-gen cap ---
    io_bytes = 2 * (Lv * D * in_bytes + lq_tile * D * in_bytes
                    + Lv * 4 + lq_tile * 4 + Lv * 3 * D * out_bytes)
    w_bytes = 2 * (3 * D * D * mm_bytes + D * 4)
    scratch_bytes = (2 * Lv + 2 * Lv * D) * 4
    inner_bytes = (Lv * lq_tile * D * (mm_bytes + 2 * 4)
                   + 6 * Lv * lq_tile * 4 + 4 * Lv * D * 4)
    vmem_limit = int(min(max(int(1.3 * (io_bytes + w_bytes + scratch_bytes + inner_bytes)),
                             32 * 1024 * 1024), vmem_cap))

    kernel = _make_kernel(Lv, Lq, lq_pad, lq_tile, D, matmul_dtype)
    return pl.pallas_call(
        kernel,
        out_shape=jax.ShapeDtypeStruct((B, Lv, 3 * D), out_dtype),
        grid_spec=pltpu.PrefetchScalarGridSpec(
            num_scalar_prefetch=0,
            grid=(B, nt),
            in_specs=[
                pl.BlockSpec((None, Lv, D), lambda b, t: (b, 0, 0)),           # vid
                pl.BlockSpec((None, lq_tile, D), lambda b, t: (b, t, 0)),      # query tile
                pl.BlockSpec((None, Lv, 1), lambda b, t: (b, 0, 0)),           # vid mask
                pl.BlockSpec((None, None, 1, lq_tile),
                             lambda b, t: (b, t, 0, 0)),                       # qmask tile
                pl.BlockSpec((3 * D, D), lambda b, t: (0, 0)),                 # w1 (pre-cast)
                pl.BlockSpec((1, D), lambda b, t: (0, 0)),                     # w2
            ],
            out_specs=pl.BlockSpec((None, Lv, 3 * D), lambda b, t: (b, 0, 0)),
            scratch_shapes=[
                pltpu.VMEM((Lv, 1), jnp.float32),    # running row max m
                pltpu.VMEM((Lv, 1), jnp.float32),    # running denom l
                pltpu.VMEM((Lv, D), jnp.float32),    # V2Q accumulator
                pltpu.VMEM((Lv, D), jnp.float32),    # hoisted v @ W1v
            ],
        ),
        compiler_params=pltpu.CompilerParams(
            dimension_semantics=("parallel", "arbitrary"),
            vmem_limit_bytes=vmem_limit,
        ),
        interpret=interpret,
    )(vid_feat, q_in, vm, qm_tiles, w1_mm, w2_row)


def vqmma_pool_ref(vid_feat, query_feat, vid_mask, query_mask, w1, w2):
    """Pure-JAX reference mirroring the PyTorch forward (high-precision matmuls)."""
    B, Lv, D = vid_feat.shape
    Lq = query_feat.shape[1]
    hp = jax.lax.Precision.HIGHEST
    _v = jnp.broadcast_to(vid_feat[:, :, None, :], (B, Lv, Lq, D))
    _q = jnp.broadcast_to(query_feat[:, None, :, :], (B, Lv, Lq, D))
    vqfeat = jnp.concatenate([_v, _q, _v * _q], axis=3)               # (B, Lv, Lq, 3D)
    hidden = jnp.maximum(jnp.einsum("blqk,kd->blqd", vqfeat, w1, precision=hp), 0.0)
    sim = jnp.einsum("blqd,do->blqo", hidden, w2, precision=hp)[..., 0]
    mask = jnp.einsum("bn,bm->bnm", vid_mask, query_mask)
    masked = sim + (1.0 - mask) * NEG_INF                             # mask_logits
    att_v2q = jax.nn.softmax(masked, axis=-1)
    v2q = jnp.einsum("bnm,bmd->bnd", att_v2q, query_feat, precision=hp)
    att_q2v = jax.nn.softmax(jnp.max(masked, axis=2), axis=-1)        # (B, Lv)
    q2v = jnp.einsum("bn,bnd->bd", att_q2v, vid_feat, precision=hp)[:, None, :]
    return jnp.concatenate([vid_feat, v2q, vid_feat * q2v], axis=2)


if __name__ == "__main__":
    # D multiple of 128 -> lane-dense output stores and full MXU K/N width.
    B, Lv, Lq, D = 2, 16, 16, 128
    key = jax.random.PRNGKey(0)
    k1, k2, k3, k4 = jax.random.split(key, 4)

    vid_feat = jax.random.normal(k1, (B, Lv, D), dtype=jnp.float32)
    query_feat = jax.random.normal(k2, (B, Lq, D), dtype=jnp.float32)

    vid_mask = jnp.ones((B, Lv), dtype=jnp.float32)
    vid_mask = vid_mask.at[1, Lv - 4:].set(0.0)        # includes fully-masked video rows
    query_mask = jnp.ones((B, Lq), dtype=jnp.float32)
    query_mask = query_mask.at[1, Lq - 3:].set(0.0)

    # Deterministic params: Linear(3D->D, no bias) and Linear(D->1, no bias),
    # stored pre-transposed for x @ W.
    w1 = jax.random.normal(k3, (3 * D, D), dtype=jnp.float32) * (1.0 / jnp.sqrt(3.0 * D))
    w2 = jax.random.normal(k4, (D, 1), dtype=jnp.float32) * (1.0 / jnp.sqrt(1.0 * D))

    ref = vqmma_pool_ref(vid_feat, query_feat, vid_mask, query_mask, w1, w2)

    # 1) f32-matmul path: masking and softmax normalization now match the reference
    #    exactly; remaining slack only covers the MXU's default f32 matmul precision.
    out_f32 = jax.block_until_ready(
        vqmma_pool(vid_feat, query_feat, vid_mask, query_mask, w1, w2,
                   matmul_dtype=jnp.float32))
    assert out_f32.shape == (B, Lv, 3 * D)
    assert jnp.allclose(out_f32, ref, atol=2e-2, rtol=2e-2), \
        "mismatch vs JAX reference (f32 matmul path)"

    # 2) Default fast path: bf16 MXU matmuls + bf16 cross slab (f32 softmax math).
    out_bf = jax.block_until_ready(
        vqmma_pool(vid_feat, query_feat, vid_mask, query_mask, w1, w2))
    assert out_bf.shape == (B, Lv, 3 * D)
    assert bool(jnp.all(jnp.isfinite(out_bf)))
    assert jnp.allclose(out_bf, ref, atol=5e-2, rtol=5e-2), \
        "mismatch vs JAX reference (bf16 matmul path)"

    # 3) Multi-tile grid path with query padding (Lq=12 -> two grid steps of tile 8):
    #    exercises the online softmax across grid steps and the padded-column masking.
    Lq2 = 12
    qf2, qm2 = query_feat[:, :Lq2], query_mask[:, :Lq2]
    ref2 = vqmma_pool_ref(vid_feat, qf2, vid_mask, qm2, w1, w2)
    out2 = jax.block_until_ready(
        vqmma_pool(vid_feat, qf2, vid_mask, qm2, w1, w2,
                   lq_tile=8, matmul_dtype=jnp.float32))
    assert out2.shape == (B, Lv, 3 * D)
    assert jnp.allclose(out2, ref2, atol=2e-2, rtol=2e-2), \
        "mismatch vs JAX reference (tiled + padded grid path)"

    print("KERNEL_OK")
</pallas_src>

<mosaic_0001>
module attributes {stable_mosaic.version = 11 : i64} {
  func.func @kernel(%arg0: i32, %arg1: i32, %arg2: memref<1x16x128xf32, #tpu.memory_space<vmem>>, %arg3: memref<1x16x128xf32, #tpu.memory_space<vmem>>, %arg4: memref<1x16x1xf32, #tpu.memory_space<vmem>>, %arg5: memref<1x1x1x16xf32, #tpu.memory_space<vmem>>, %arg6: memref<384x128xf32, #tpu.memory_space<vmem>>, %arg7: memref<1x128xf32, #tpu.memory_space<vmem>>, %arg8: memref<1x16x384xf32, #tpu.memory_space<vmem>>, %arg9: memref<16x1xf32, #tpu.memory_space<vmem>>, %arg10: memref<16x1xf32, #tpu.memory_space<vmem>>, %arg11: memref<16x128xf32, #tpu.memory_space<vmem>>, %arg12: memref<16x128xf32, #tpu.memory_space<vmem>>) attributes {dimension_semantics = [#tpu.dimension_semantics<parallel>, #tpu.dimension_semantics<arbitrary>], iteration_bounds = array<i64: 2, 1>, scalar_prefetch = 0 : i64, scratch_operands = 4 : i64, tpu.core_type = #tpu.core_type<tc>, window_params = [{transform_indices = @transform_0, window_bounds = array<i64: 1, 16, 128>}, {transform_indices = @transform_1, window_bounds = array<i64: 1, 16, 128>}, {transform_indices = @transform_2, window_bounds = array<i64: 1, 16, 1>}, {transform_indices = @transform_3, window_bounds = array<i64: 1, 1, 1, 16>}, {pipeline_mode = #tpu.pipeline_mode<synchronous>, transform_indices = @transform_4, window_bounds = array<i64: 384, 128>}, {pipeline_mode = #tpu.pipeline_mode<synchronous>, transform_indices = @transform_5, window_bounds = array<i64: 1, 128>}, {transform_indices = @transform_6, window_bounds = array<i64: 1, 16, 384>}]} {
    %c0 = arith.constant 0 : index
    %c0_0 = arith.constant 0 : index
    %c0_1 = arith.constant 0 : index
    %0 = vector.load %arg2[%c0, %c0_0, %c0_1] : memref<1x16x128xf32, #tpu.memory_space<vmem>>, vector<1x16x128xf32>
    %1 = vector.shape_cast %0 : vector<1x16x128xf32> to vector<16x128xf32>
    %c128 = arith.constant 128 : index
    %c0_2 = arith.constant 0 : index
    %2 = vector.load %arg6[%c128, %c0_2] : memref<384x128xf32, #tpu.memory_space<vmem>>, vector<128x128xf32>
    %c256 = arith.constant 256 : index
    %c0_3 = arith.constant 0 : index
    %3 = vector.load %arg6[%c256, %c0_3] : memref<384x128xf32, #tpu.memory_space<vmem>>, vector<128x128xf32>
    %c0_i32 = arith.constant 0 : i32
    %4 = arith.cmpi eq, %arg1, %c0_i32 : i32
    %5 = arith.extui %4 : i1 to i32
    %c0_i32_4 = arith.constant 0 : i32
    %6 = arith.cmpi ne, %5, %c0_i32_4 : i32
    scf.if %6 {
      %cst_41 = arith.constant 0xFF800000 : f32
      %69 = vector.broadcast %cst_41 : f32 to vector<16x1xf32>
      %c0_42 = arith.constant 0 : index
      %c0_43 = arith.constant 0 : index
      %70 = vector.load %arg9[%c0_42, %c0_43] : memref<16x1xf32, #tpu.memory_space<vmem>>, vector<16x1xf32>
      tpu.vector_store %arg9[%c0_42, %c0_43], %69 {strides = array<i32>} : memref<16x1xf32, #tpu.memory_space<vmem>>, vector<16x1xf32>,
      %cst_44 = arith.constant 0.000000e+00 : f32
      %71 = vector.broadcast %cst_44 : f32 to vector<16x1xf32>
      %c0_45 = arith.constant 0 : index
      %c0_46 = arith.constant 0 : index
      %72 = vector.load %arg10[%c0_45, %c0_46] : memref<16x1xf32, #tpu.memory_space<vmem>>, vector<16x1xf32>
      tpu.vector_store %arg10[%c0_45, %c0_46], %71 {strides = array<i32>} : memref<16x1xf32, #tpu.memory_space<vmem>>, vector<16x1xf32>,
      %cst_47 = arith.constant 0.000000e+00 : f32
      %73 = vector.broadcast %cst_47 : f32 to vector<16x128xf32>
      %c0_48 = arith.constant 0 : index
      %c0_49 = arith.constant 0 : index
      %74 = vector.load %arg11[%c0_48, %c0_49] : memref<16x128xf32, #tpu.memory_space<vmem>>, vector<16x128xf32>
      tpu.vector_store %arg11[%c0_48, %c0_49], %73 {strides = array<i32>} : memref<16x128xf32, #tpu.memory_space<vmem>>, vector<16x128xf32>,
      %c0_50 = arith.constant 0 : index
      %c0_51 = arith.constant 0 : index
      %75 = vector.load %arg6[%c0_50, %c0_51] : memref<384x128xf32, #tpu.memory_space<vmem>>, vector<128x128xf32>
      %cst_52 = arith.constant dense<0.000000e+00> : vector<16x128xf32>
      %76 = tpu.matmul %1, %75, %cst_52 {dimension_numbers = #tpu.dot_dimension_numbers<[1], [0], [0], [1], [0, 0, 1, 1], [], []>} : vector<16x128xf32>, vector<128x128xf32>, vector<16x128xf32> -> vector<16x128xf32>
      %c0_53 = arith.constant 0 : index
      %c0_54 = arith.constant 0 : index
      %77 = vector.load %arg12[%c0_53, %c0_54] : memref<16x128xf32, #tpu.memory_space<vmem>>, vector<16x128xf32>
      tpu.vector_store %arg12[%c0_53, %c0_54], %76 {strides = array<i32>} : memref<16x128xf32, #tpu.memory_space<vmem>>, vector<16x128xf32>,
    } else {
    }
    %c0_5 = arith.constant 0 : index
    %c0_6 = arith.constant 0 : index
    %c0_7 = arith.constant 0 : index
    %7 = vector.load %arg3[%c0_5, %c0_6, %c0_7] : memref<1x16x128xf32, #tpu.memory_space<vmem>>, vector<1x16x128xf32>
    %8 = vector.shape_cast %7 : vector<1x16x128xf32> to vector<16x128xf32>
    %c0_8 = arith.constant 0 : index
    %c0_9 = arith.constant 0 : index
    %c0_10 = arith.constant 0 : index
    %c0_11 = arith.constant 0 : index
    %9 = vector.load %arg5[%c0_8, %c0_9, %c0_10, %c0_11] : memref<1x1x1x16xf32, #tpu.memory_space<vmem>>, vector<1x1x1x16xf32>
    %10 = vector.shape_cast %9 : vector<1x1x1x16xf32> to vector<1x16xf32>
    %c0_12 = arith.constant 0 : index
    %c0_13 = arith.constant 0 : index
    %c0_14 = arith.constant 0 : index
    %11 = vector.load %arg4[%c0_12, %c0_13, %c0_14] : memref<1x16x1xf32, #tpu.memory_space<vmem>>, vector<1x16x1xf32>
    %12 = vector.shape_cast %11 : vector<1x16x1xf32> to vector<16x1xf32>
    %cst = arith.constant dense<0.000000e+00> : vector<16x128xf32>
    %13 = tpu.matmul %8, %2, %cst {dimension_numbers = #tpu.dot_dimension_numbers<[1], [0], [0], [1], [0, 0, 1, 1], [], []>} : vector<16x128xf32>, vector<128x128xf32>, vector<16x128xf32> -> vector<16x128xf32>
    %14 = vector.shape_cast %1 : vector<16x128xf32> to vector<16x1x128xf32>
    %15 = vector.shape_cast %8 : vector<16x128xf32> to vector<1x16x128xf32>
    %16 = vector.broadcast %14 : vector<16x1x128xf32> to vector<16x16x128xf32>
    %17 = vector.broadcast %15 : vector<1x16x128xf32> to vector<16x16x128xf32>
    %18 = arith.mulf %16, %17 : vector<16x16x128xf32>
    %19 = vector.shape_cast %18 : vector<16x16x128xf32> to vector<256x128xf32>
    %cst_15 = arith.constant dense<0.000000e+00> : vector<256x128xf32>
    %20 = tpu.matmul %19, %3, %cst_15 {dimension_numbers = #tpu.dot_dimension_numbers<[1], [0], [0], [1], [0, 0, 1, 1], [], []>} : vector<256x128xf32>, vector<128x128xf32>, vector<256x128xf32> -> vector<256x128xf32>
    %21 = vector.shape_cast %20 : vector<256x128xf32> to vector<16x16x128xf32>
    %c0_16 = arith.constant 0 : index
    %c0_17 = arith.constant 0 : index
    %22 = vector.load %arg12[%c0_16, %c0_17] : memref<16x128xf32, #tpu.memory_space<vmem>>, vector<16x128xf32>
    %23 = vector.shape_cast %22 : vector<16x128xf32> to vector<16x1x128xf32>
    %24 = vector.shape_cast %13 : vector<16x128xf32> to vector<1x16x128xf32>
    %25 = vector.broadcast %23 : vector<16x1x128xf32> to vector<16x16x128xf32>
    %26 = vector.broadcast %24 : vector<1x16x128xf32> to vector<16x16x128xf32>
    %27 = arith.addf %25, %26 : vector<16x16x128xf32>
    %28 = arith.addf %27, %21 : vector<16x16x128xf32>
    %cst_18 = arith.constant 0.000000e+00 : f32
    %29 = vector.broadcast %cst_18 : f32 to vector<16x16x128xf32>
    %30 = arith.maximumf %28, %29 : vector<16x16x128xf32>
    %c0_19 = arith.constant 0 : index
    %c0_20 = arith.constant 0 : index
    %31 = vector.load %arg7[%c0_19, %c0_20] : memref<1x128xf32, #tpu.memory_space<vmem>>, vector<1x128xf32>
    %32 = vector.shape_cast %31 : vector<1x128xf32> to vector<1x1x128xf32>
    %33 = vector.broadcast %32 : vector<1x1x128xf32> to vector<16x16x128xf32>
    %34 = arith.mulf %30, %33 : vector<16x16x128xf32>
    %cst_21 = arith.constant dense<0.000000e+00> : vector<16x16xf32>
    %35 = vector.multi_reduction <add>, %34, %cst_21 [2] : vector<16x16x128xf32> to vector<16x16xf32>
    %36 = vector.broadcast %12 : vector<16x1xf32> to vector<16x16xf32>
    %37 = vector.broadcast %10 : vector<1x16xf32> to vector<16x16xf32>
    %38 = arith.mulf %36, %37 : vector<16x16xf32>
    %cst_22 = arith.constant 1.000000e+00 : f32
    %39 = vector.broadcast %cst_22 : f32 to vector<16x16xf32>
    %40 = arith.subf %39, %38 : vector<16x16xf32>
    %cst_23 = arith.constant -1.000000e+30 : f32
    %41 = vector.broadcast %cst_23 : f32 to vector<16x16xf32>
    %42 = arith.mulf %40, %41 : vector<16x16xf32>
    %43 = arith.addf %35, %42 : vector<16x16xf32>
    %c0_24 = arith.constant 0 : index
    %c0_25 = arith.constant 0 : index
    %44 = vector.load %arg9[%c0_24, %c0_25] : memref<16x1xf32, #tpu.memory_space<vmem>>, vector<16x1xf32>
    %cst_26 = arith.constant dense<0xFF800000> : vector<16xf32>
    %45 = vector.multi_reduction <maximumf>, %43, %cst_26 [1] : vector<16x16xf32> to vector<16xf32>
    %46 = vector.shape_cast %45 : vector<16xf32> to vector<16x1xf32>
    %47 = arith.maximumf %44, %46 : vector<16x1xf32>
    %48 = arith.subf %44, %47 : vector<16x1xf32>
    %49 = math.exp %48 : vector<16x1xf32>
    %50 = vector.broadcast %47 : vector<16x1xf32> to vector<16x16xf32>
    %51 = arith.subf %43, %50 : vector<16x16xf32>
    %52 = math.exp %51 : vector<16x16xf32>
    %c0_27 = arith.constant 0 : index
    %c0_28 = arith.constant 0 : index
    %53 = vector.load %arg10[%c0_27, %c0_28] : memref<16x1xf32, #tpu.memory_space<vmem>>, vector<16x1xf32>
    %54 = arith.mulf %49, %53 : vector<16x1xf32>
    %cst_29 = arith.constant dense<0.000000e+00> : vector<16xf32>
    %55 = vector.multi_reduction <add>, %52, %cst_29 [1] : vector<16x16xf32> to vector<16xf32>
    %56 = vector.shape_cast %55 : vector<16xf32> to vector<16x1xf32>
    %57 = arith.addf %54, %56 : vector<16x1xf32>
    %c0_30 = arith.constant 0 : index
    %c0_31 = arith.constant 0 : index
    %58 = vector.load %arg10[%c0_30, %c0_31] : memref<16x1xf32, #tpu.memory_space<vmem>>, vector<16x1xf32>
    tpu.vector_store %arg10[%c0_30, %c0_31], %57 {strides = array<i32>} : memref<16x1xf32, #tpu.memory_space<vmem>>, vector<16x1xf32>,
    %c0_32 = arith.constant 0 : index
    %c0_33 = arith.constant 0 : index
    %59 = vector.load %arg11[%c0_32, %c0_33] : memref<16x128xf32, #tpu.memory_space<vmem>>, vector<16x128xf32>
    %60 = vector.broadcast %49 : vector<16x1xf32> to vector<16x128xf32>
    %61 = arith.mulf %60, %59 : vector<16x128xf32>
    %cst_34 = arith.constant dense<0.000000e+00> : vector<16x128xf32>
    %62 = tpu.matmul %52, %8, %cst_34 {dimension_numbers = #tpu.dot_dimension_numbers<[1], [0], [0], [1], [0, 0, 1, 1], [], []>} : vector<16x16xf32>, vector<16x128xf32>, vector<16x128xf32> -> vector<16x128xf32>
    %63 = arith.addf %61, %62 : vector<16x128xf32>
    %c0_35 = arith.constant 0 : index
    %c0_36 = arith.constant 0 : index
    %64 = vector.load %arg11[%c0_35, %c0_36] : memref<16x128xf32, #tpu.memory_space<vmem>>, vector<16x128xf32>
    tpu.vector_store %arg11[%c0_35, %c0_36], %63 {strides = array<i32>} : memref<16x128xf32, #tpu.memory_space<vmem>>, vector<16x128xf32>,
    %c0_37 = arith.constant 0 : index
    %c0_38 = arith.constant 0 : index
    %65 = vector.load %arg9[%c0_37, %c0_38] : memref<16x1xf32, #tpu.memory_space<vmem>>, vector<16x1xf32>
    tpu.vector_store %arg9[%c0_37, %c0_38], %47 {strides = array<i32>} : memref<16x1xf32, #tpu.memory_space<vmem>>, vector<16x1xf32>,
    %c0_i32_39 = arith.constant 0 : i32
    %66 = arith.cmpi eq, %arg1, %c0_i32_39 : i32
    %67 = arith.extui %66 : i1 to i32
    %c0_i32_40 = arith.constant 0 : i32
    %68 = arith.cmpi ne, %67, %c0_i32_40 : i32
    scf.if %68 {
      %c0_41 = arith.constant 0 : index
      %c0_42 = arith.constant 0 : index
      %69 = vector.load %arg9[%c0_41, %c0_42] : memref<16x1xf32, #tpu.memory_space<vmem>>, vector<16x1xf32>
      %c0_43 = arith.constant 0 : index
      %c0_44 = arith.constant 0 : index
      %70 = vector.load %arg11[%c0_43, %c0_44] : memref<16x128xf32, #tpu.memory_space<vmem>>, vector<16x128xf32>
      %c0_45 = arith.constant 0 : index
      %c0_46 = arith.constant 0 : index
      %71 = vector.load %arg10[%c0_45, %c0_46] : memref<16x1xf32, #tpu.memory_space<vmem>>, vector<16x1xf32>
      %72 = vector.broadcast %71 : vector<16x1xf32> to vector<16x128xf32>
      %73 = arith.divf %70, %72 : vector<16x128xf32>
      %cst_47 = arith.constant dense<0xFF800000> : vector<1xf32>
      %74 = vector.multi_reduction <maximumf>, %69, %cst_47 [0] : vector<16x1xf32> to vector<1xf32>
      %75 = vector.shape_cast %74 : vector<1xf32> to vector<1x1xf32>
      %76 = vector.broadcast %75 : vector<1x1xf32> to vector<16x1xf32>
      %77 = arith.subf %69, %76 : vector<16x1xf32>
      %78 = math.exp %77 : vector<16x1xf32>
      %cst_48 = arith.constant dense<0.000000e+00> : vector<1xf32>
      %79 = vector.multi_reduction <add>, %78, %cst_48 [0] : vector<16x1xf32> to vector<1xf32>
      %80 = vector.shape_cast %79 : vector<1xf32> to vector<1x1xf32>
      %81 = vector.broadcast %80 : vector<1x1xf32> to vector<16x1xf32>
      %82 = arith.divf %78, %81 : vector<16x1xf32>
      %83 = vector.broadcast %82 : vector<16x1xf32> to vector<16x128xf32>
      %84 = arith.mulf %83, %1 : vector<16x128xf32>
      %cst_49 = arith.constant dense<0.000000e+00> : vector<128xf32>
      %85 = vector.multi_reduction <add>, %84, %cst_49 [0] : vector<16x128xf32> to vector<128xf32>
      %86 = vector.shape_cast %85 : vector<128xf32> to vector<1x128xf32>
      %c0_50 = arith.constant 0 : index
      %c0_51 = arith.constant 0 : index
      %c0_52 = arith.constant 0 : index
      %87 = vector.load %arg8[%c0_50, %c0_51, %c0_52] : memref<1x16x384xf32, #tpu.memory_space<vmem>>, vector<1x16x128xf32>
      %88 = vector.shape_cast %87 : vector<1x16x128xf32> to vector<16x128xf32>
      %89 = vector.shape_cast %1 : vector<16x128xf32> to vector<1x16x128xf32>
      tpu.vector_store %arg8[%c0_50, %c0_51, %c0_52], %89 {strides = array<i32>} : memref<1x16x384xf32, #tpu.memory_space<vmem>>, vector<1x16x128xf32>,
      %c0_53 = arith.constant 0 : index
      %c0_54 = arith.constant 0 : index
      %c128_55 = arith.constant 128 : index
      %90 = vector.load %arg8[%c0_53, %c0_54, %c128_55] : memref<1x16x384xf32, #tpu.memory_space<vmem>>, vector<1x16x128xf32>
      %91 = vector.shape_cast %90 : vector<1x16x128xf32> to vector<16x128xf32>
      %92 = vector.shape_cast %73 : vector<16x128xf32> to vector<1x16x128xf32>
      tpu.vector_store %arg8[%c0_53, %c0_54, %c128_55], %92 {strides = array<i32>} : memref<1x16x384xf32, #tpu.memory_space<vmem>>, vector<1x16x128xf32>,
      %93 = vector.broadcast %86 : vector<1x128xf32> to vector<16x128xf32>
      %94 = arith.mulf %1, %93 : vector<16x128xf32>
      %c0_56 = arith.constant 0 : index
      %c0_57 = arith.constant 0 : index
      %c256_58 = arith.constant 256 : index
      %95 = vector.load %arg8[%c0_56, %c0_57, %c256_58] : memref<1x16x384xf32, #tpu.memory_space<vmem>>, vector<1x16x128xf32>
      %96 = vector.shape_cast %95 : vector<1x16x128xf32> to vector<16x128xf32>
      %97 = vector.shape_cast %94 : vector<16x128xf32> to vector<1x16x128xf32>
      tpu.vector_store %arg8[%c0_56, %c0_57, %c256_58], %97 {strides = array<i32>} : memref<1x16x384xf32, #tpu.memory_space<vmem>>, vector<1x16x128xf32>,
    } else {
    }
    return
  }
  func.func @transform_0(%arg0: i32, %arg1: i32) -> (i32, i32, i32) {
    %c0_i32 = arith.constant 0 : i32
    %c0_i32_0 = arith.constant 0 : i32
    %c0_i32_1 = arith.constant 0 : i32
    return %arg0, %c0_i32, %c0_i32_0 : i32, i32, i32
  }
  func.func @transform_1(%arg0: i32, %arg1: i32) -> (i32, i32, i32) {
    %c0_i32 = arith.constant 0 : i32
    %c0_i32_0 = arith.constant 0 : i32
    return %arg0, %arg1, %c0_i32 : i32, i32, i32
  }
  func.func @transform_2(%arg0: i32, %arg1: i32) -> (i32, i32, i32) {
    %c0_i32 = arith.constant 0 : i32
    %c0_i32_0 = arith.constant 0 : i32
    %c0_i32_1 = arith.constant 0 : i32
    return %arg0, %c0_i32, %c0_i32_0 : i32, i32, i32
  }
  func.func @transform_3(%arg0: i32, %arg1: i32) -> (i32, i32, i32, i32) {
    %c0_i32 = arith.constant 0 : i32
    %c0_i32_0 = arith.constant 0 : i32
    %c0_i32_1 = arith.constant 0 : i32
    return %arg0, %arg1, %c0_i32, %c0_i32_0 : i32, i32, i32, i32
  }
  func.func @transform_4(%arg0: i32, %arg1: i32) -> (i32, i32) {
    %c0_i32 = arith.constant 0 : i32
    %c0_i32_0 = arith.constant 0 : i32
    %c0_i32_1 = arith.constant 0 : i32
    return %c0_i32, %c0_i32_0 : i32, i32
  }
  func.func @transform_5(%arg0: i32, %arg1: i32) -> (i32, i32) {
    %c0_i32 = arith.constant 0 : i32
    %c0_i32_0 = arith.constant 0 : i32
    %c0_i32_1 = arith.constant 0 : i32
    return %c0_i32, %c0_i32_0 : i32, i32
  }
  func.func @transform_6(%arg0: i32, %arg1: i32) -> (i32, i32, i32) {
    %c0_i32 = arith.constant 0 : i32
    %c0_i32_0 = arith.constant 0 : i32
    %c0_i32_1 = arith.constant 0 : i32
    return %arg0, %c0_i32, %c0_i32_0 : i32, i32, i32
  }
}

</mosaic_0001>

<bundles_post_ra>
// kernel: tpu_custom_call.1
= control target key start
LH: loop header
LB: loop body
LE: loop exit
PB: predicated region body
PF: predicated region fallthrough
CT: control target
= control target key end

     0   :  { %11 = vsyncpa [#allocation7], 0  ;;  %s4526_s0 = inlined_call_operand.vmem [shape: f32[2,16,128], index: 0, kind: input, shape index: {}]   ;;  %s4527_s1 = inlined_call_operand.hbm [shape: f32[2,16,128], index: 1, kind: input, shape index: {}]   ;;  %s4528_s2 = inlined_call_operand.vmem [shape: f32[2,16,1], index: 2, kind: input, shape index: {}]   ;;  %s4529_s3 = inlined_call_operand.vmem [shape: f32[2,1,1,16], index: 3, kind: input, shape index: {}]   ;;  %s4530_s4 = inlined_call_operand.hbm [shape: f32[384,128], index: 4, kind: input, shape index: {}]   ;;  %s4531_s5 = inlined_call_operand.vmem [shape: f32[1,128], index: 5, kind: input, shape index: {}]   ;;  %s4532_s6 = inlined_call_operand.hbm [shape: f32[2,16,384], index: 6, kind: output, shape index: {}]  }
   0x1   :  { %13 = vsyncpa [#allocation7 + $0x1], 0 }
   0x2   :  { %14 = vsyncpa [#allocation10], 0 }
   0x3   :  { %15 = vsyncpa [#allocation8], 0 }
   0x4   :  { %17 = vsyncpa [#allocation8 + $0x1], 0  ;;  %s3521_s21 = smov 0   ;;  %s3523_s22 = smov 0  }
   0x5   :  { %s3525_s23 = smov 0   ;;  %s3527_s24 = smov 0  }
   0x6   :  { %s3529_s25 = smov 0   ;;  %s3531_s26 = smov 0  }
   0x7 LB: > { %s2790_s27 = sadd.s32 4294967295, %s3473_s26   ;;  %s2791_s28 = sadd.s32 4294967294, %s3473_s26   ;;  %s3473_s26 = sphi %s3531_s26, %s23_s26   ;;  %s3469_s25 = sphi %s3529_s25, %s4569_s25   ;;  %s3465_s24 = sphi %s3527_s24, %s4568_s24   ;;  %s3461_s23 = sphi %s3525_s23, %s4567_s23   ;;  %s3457_s22 = sphi %s3523_s22, %s4566_s22   ;;  %s3453_s21 = sphi %s3521_s21, %s4565_s21  }
   0x8   : > { %p83_p0 = scmp.ne.s32.totalorder %s3457_s22, %s3453_s21  ;;  %p3555_p1 = scmp.eq.s32.totalorder %s2790_s27, 0 }
   0x9   : > { %p3559_p2 = scmp.eq.s32.totalorder %s2790_s27, 1  ;;  %p209_p3 = scmp.eq.s32.totalorder %s2791_s28, 1 }
   0xa   : > { %s4542_s29 = scalar_select %p3555_p1, 1, 0 }
   0xb   : > { %s4543_s30 = scalar_select %p3559_p2, 1, 0 }
   0xc   : > { %p3565_p4 = por %p3555_p1, %p83_p0  ;;  %p2792_p5 = scmp.ge.s32.totalorder %s3473_s26, 1 }
   0xd   : > { %p3570_p6 = por %p209_p3, %p83_p0  ;;  %p216_p7 = scmp.lt.s32.totalorder %s3473_s26, 3 }
   0xe   : > { %s4544_s7 = scalar_select %p3565_p4, 1, 0 }
   0xf   : > { %s4545_s8 = scalar_select %p3570_p6, 1, 0 }
  0x10   : > { %p3575_p8 = pnand %p2792_p5, %p216_p7  ;;  %s3475_s10 = smov [#allocation9]  }
  0x11   : > { %s228_s11 = sshll.u32 %s3475_s10, 4  ;;  %s35_s13 = sadd.s32 1, %s3469_s25  ;;  %s229_s11 = int_to_ptr.vmem [resolvable:$true] %s228_s11 }
  0x12   : > { %s4546_s9 = scalar_select %p3575_p8, 1, 0 }
  0x13   : > { %p3170_p9 = pneg %p3575_p8  ;;  %s3329_s16 = scalar_lea.hbm %s4530_s4, 6144 }
  0x14   : > { %p3330_p12 = scmp.ne.s32.totalorder %s4530_s4, %s3329_s16  ;;  %p3336_p5 = scmp.lt.u32.totalorder %s3329_s16, %s4530_s4 }
  0x15   : > { %p3584_p11 = pnand %p3170_p9, %p3555_p1 }
  0x17   : > { %p3331_p13 = pneg %p3584_p11 }
  0x19   : > { %p3332_p0 = pnand %p3331_p13, %p3330_p12 }
  0x1b   : > { %p3333_p3 = pneg %p3332_p0 }
  0x1d   : > { %p3338_p7 = pnand %p3336_p5, %p3333_p3 }
  0x1f   : > { %3341 = shalt.err (!%p3338_p7)
}
  0x20   : > { %s3342_s27 = scalar_lea.vmem %s229_s11, 6144  ;;  %p3350_p1 = scmp.lt.s32.totalorder %s229_s11, %s229_s11 }
  0x21   : > { %p3343_p9 = scmp.ne.s32.totalorder %s229_s11, %s3342_s27  ;;  %p3351_p4 = scmp.lt.s32.totalorder %s3342_s27, %s3342_s27 }
  0x23   : > { %p3345_p10 = pnand %p3343_p9, %p3331_p13  ;;  %p3352_p8 = por %p3351_p4, %p3350_p1 }
  0x25   : > { %p3346_p6 = pneg %p3345_p10 }
  0x27   : > { %p3353_p2 = pnand %p3352_p8, %p3346_p6 }
  0x29   : > { %3356 = shalt.err (!%p3353_p2)
}
  0x2a   : > { %s4537_s28 = smov 128   ;;  %s4538_s10 = smov 8  }
  0x2b   : > { %3173 = dma.hbm_to_vmem [thread:$0]  (!%p3584_p11), %s4530_s4, 6144, %s229_s11, [#allocation10], %s4537_s28, %s4537_s28, %s4538_s10  }
  0x2c   : > { %p37_p1 = scmp.ge.s32.totalorder %s35_s13, 2  ;;  %s70_s16 = sadd.s32 1, %s3461_s23 }
  0x2d   : > { %p77_p2 = scmp.ne.s32.totalorder %s3461_s23, %s3457_s22  ;;  %p78_p4 = scmp.eq.s32.totalorder %s3473_s26, 0 }
  0x2e   : > { %s4571_s13 = smov (%p37_p1, %s35_s13), 0  ;;  %p4549_p8 = scmp.ne.s32.totalorder %s4543_s30, 0 }
  0x2f   : > { %p3614_p6 = por %p78_p4, %p77_p2  ;;  %s65_s18 = ssub.s32 %s3469_s25, %s4571_s13 }
  0x30   : > { %p3620_p10 = por %p4549_p8, %p77_p2  ;;  %p3183_p12 = scmp.lt.s32.totalorder %s3473_s26, 2 }
  0x31   : > { %p68_p11 = scmp.eq.s32.totalorder %s65_s18, 0  ;;  %s253_s11 = sand.u32 1, %s3461_s23  }
  0x32   : > { %s2795_s19 = sshll.u32 %s253_s11, 4  ;;  %s2812_s27 = sshll.u32 %s3469_s25, 8 }
  0x33   : > { %s3629_s20 = scalar_select %p68_p11, %s3461_s23, %s70_s16  }
  0x34   : > { %s3635_s28 = scalar_lea.hbm %s4527_s1, %s2812_s27  ;;  %s257_s30 = scalar_lea.vmem [#allocation6], %s2795_s19 }
  0x35   : > { %s266_s10 = sshll.u32 %s257_s30, 4  ;;  %p3641_p13 = pnand %p3183_p12, %p3614_p6  ;;  %s3637_s10 = int_to_ptr.vmem [resolvable:$true] %s266_s10 }
  0x36   : > { %s3645_s16 = scalar_lea.sflag [#allocation7], %s253_s11  ;;  %s3357_s14 = scalar_lea.hbm %s3635_s28, 256 }
  0x37   : > { %p3358_p0 = scmp.ne.s32.totalorder %s3635_s28, %s3357_s14  ;;  %p3359_p3 = pneg %p3641_p13 }
  0x38   : > { %s3362_s17 = scalar_lea.hbm %s4527_s1, 512  ;;  %p3363_p9 = scmp.lt.u32.totalorder %s3635_s28, %s4527_s1 }
  0x39   : > { %p3360_p5 = pnand %p3359_p3, %p3358_p0  ;;  %p3364_p1 = scmp.lt.u32.totalorder %s3362_s17, %s3357_s14 }
  0x3a   : > { %p3366_p4 = scmp.lt.u32.totalorder %s3357_s14, %s3635_s28 }
  0x3b   : > { %p3361_p7 = pneg %p3360_p5  ;;  %p3365_p2 = por %p3364_p1, %p3363_p9 }
  0x3d   : > { %p3367_p6 = por %p3366_p4, %p3365_p2 }
  0x3f   : > { %p3368_p8 = pnand %p3367_p6, %p3361_p7 }
  0x41   : > { %3371 = shalt.err (!%p3368_p8)
}
  0x42   : > { %s3372_s11 = scalar_lea.vmem %s3637_s10, 256  ;;  %s3478_s19 = smov [#allocation6]  }
  0x43   : > { %p3373_p12 = scmp.ne.s32.totalorder %s3637_s10, %s3372_s11  ;;  %s3377_s27 = sshll.u32 %s3478_s19, 4  ;;  %s3378_s27 = int_to_ptr.vmem [resolvable:$false] %s3377_s27 }
  0x44   : > { %s3379_s15 = scalar_lea.vmem %s3378_s27, 512  ;;  %p3380_p5 = scmp.lt.s32.totalorder %s3637_s10, %s3378_s27 }
  0x45   : > { %p3375_p11 = pnand %p3373_p12, %p3359_p3  ;;  %p3381_p9 = scmp.lt.s32.totalorder %s3379_s15, %s3372_s11 }
  0x47   : > { %p3376_p0 = pneg %p3375_p11  ;;  %p3382_p1 = por %p3381_p9, %p3380_p5 }
  0x49   : > { %p3383_p2 = pnand %p3382_p1, %p3376_p0 }
  0x4b   : > { %3386 = shalt.err (!%p3383_p2)
}
  0x4c   : > { %s4552_s14 = smov 8   ;;  %s4553_s17 = smov 128  }
  0x4d   : > { %3177 = dma.hbm_to_vmem [thread:$0]  (!%p3641_p13), %s3635_s28, 256, %s3637_s10, %s3645_s16, %s4553_s17, %s4553_s17, %s4552_s14  }
  0x4e   : > { %p4554_p3 = scmp.ne.s32.totalorder %s4546_s9, 0 }
  0x50   : > { %295 = sbr.rel (%p4554_p3) target bundleno = 1500 (0x5dc), region = 44 }
  0x57   : > { %s3679_s30 = sand.u32 1, %s3457_s22   ;;  %p4555_p7 = scmp.ne.s32.totalorder %s4544_s7, 0 }
  0x58   : > { %s2799_s11 = sshll.u32 %s3679_s30, 4  ;;  %s298_s19 = scalar_lea.sflag [#allocation7], %s3679_s30 }
  0x59   : > { %s3683_s27 = scalar_lea.vmem [#allocation6], %s2799_s11 }
  0x5a   : > { %3440 = dma.done.wait (%p4555_p7), %s298_s19, 256  }
  0x5b   : > { %3442 = vsyncadd (%p4555_p7), %s298_s19, 4294967040  ;;  %p4556_p13 = scmp.ne.s32.totalorder %s4542_s29, 0 }
  0x5d   : > { %3444 = dma.done.wait (%p4556_p13), [#allocation10], 6144  }
  0x5e   : > { %3446 = vsyncadd (%p4556_p13), [#allocation10], 4294961152  ;;  %p350_p4 = scmp.lt.s32.totalorder %s3465_s24, 1  ;;  %v591_v0 = vlaneseq  ;;  %v3479_v1 = vmov 0   ;;  %s3160_s9 = smul.u32 48, %s3679_s30  ;;  %v412_v14 = vld [vmem:[#allocation9] sm:$0xff] }
  0x5f   : > { %3243 = vset.pattern.permute.xlu0 %v3479_v1  ;;  %3244 = vset.pattern.permute.xlu1 %v3479_v1  ;;  %v3480_v2 = vmov 1966171168   ;;  %v413_v15 = vld [vmem:[#allocation9 + $0x8] sm:$0xff]  ;;  %v385_v16 = vld [vmem:[#allocation9 + $0x100] sm:$0xff]  ;;  %v414_v20 = vld [vmem:[#allocation9 + $0x10] sm:$0xff]  ;;  %vm405_vm0 = vcmask 7168  }
  0x60   : > { %v589_v3 = vunpack.c.l.s4 %v3480_v2  ;;  %v3695_v4 = vshrl.u32 %v591_v0, 7  ;;  %v1798_v5 = vand.u32 127, %v591_v0  ;;  %s3698_s7 = scalar_select %p350_p4, %s3465_s24, 1  ;;  %v3060_v18 = vpack.c.bf16 %v413_v15, %v412_v14  ;;  %v386_v19 = vld [vmem:[#allocation9 + $0x108] sm:$0xff]  ;;  %v415_v21 = vld [vmem:[#allocation9 + $0x18] sm:$0xff]  ;;  %v387_v24 = vld [vmem:[#allocation9 + $0x110] sm:$0xff] }
  0x61   : > { %s3720_s17 = scalar_lea.vmem [#allocation11], %s3160_s9  ;;  %v3124_v22 = vpack.c.bf16 %v386_v19, %v385_v16  ;;  %v3064_v23 = vpack.c.bf16 %v415_v21, %v414_v20  ;;  %v388_v25 = vld [vmem:[#allocation9 + $0x118] sm:$0xff]  ;;  %v416_v28 = vld [vmem:[#allocation9 + $0x20] sm:$0xff]  ;;  %v417_v29 = vld [vmem:[#allocation9 + $0x28] sm:$0xff]  ;;  %vm1808_vm1 = vcmask 130112   ;;  %vm1945_vm2 = vcmask 1041409  }
  0x62   : > { %v590_v6 = vunpack.c.0.s8 %v589_v3  ;;  %v3701_v7 = vsub.s32 %v1798_v5, %v3695_v4  ;;  %v1803_v8 = vadd.s32 4294967288, %v1798_v5  ;;  %s2813_s29 = sshll.u32 %s3698_s7, 4  ;;  %3061 = vmatprep.subr.bf16.mxu1 %v3060_v18  ;;  %v3128_v27 = vpack.c.bf16 %v388_v25, %v387_v24  ;;  %v389_v30 = vld [vmem:[#allocation9 + $0x120] sm:$0xff]  ;;  %v390_v31 = vld [vmem:[#allocation9 + $0x128] sm:$0xff]  ;;  %v418_v36 = vld [vmem:[#allocation9 + $0x30] sm:$0xff]  ;;  %s366_s9 = scalar_lea.vmem %s4529_s3, %s3698_s7 }
  0x63   : > { %s354_s18 = scalar_lea.vmem %s4526_s0, %s2813_s29  ;;  %s360_s14 = scalar_lea.vmem %s4528_s2, %s2813_s29  ;;  %3125 = vmatprep.subr.bf16.mxu0 %v3124_v22  ;;  %3063 = vmatpush3.bf16.msra.mxu1 %v3060_v18  ;;  %v3736_v33 = vsub.s32 0, %v3695_v4  ;;  %v3068_v34 = vpack.c.bf16 %v417_v29, %v416_v28  ;;  %v3132_v35 = vpack.c.bf16 %v390_v31, %v389_v30  ;;  %v419_v37 = vld [vmem:[#allocation9 + $0x38] sm:$0xff]  ;;  %v391_v38 = vld [vmem:[#allocation9 + $0x130] sm:$0xff]  ;;  %v420_v43 = vld [vmem:[#allocation9 + $0x40] sm:$0xff]  ;;  %vm1947_vm3 = vcmask 1042434  }
  0x64   : > { %v3711_v9 = vsub.s32 %v590_v6, %v3695_v4  ;;  %v3714_v10 = vsub.s32 %v1803_v8, %v3695_v4  ;;  %v508_v11 = vld [vmem:[%s360_s14] sm:$0xff]  ;;  %v3718_v13 = vld [vmem:[%s354_s18 + $0x8] sm:$0xff]  ;;  %3127 = vmatpush3.bf16.msra.mxu0 %v3124_v22  ;;  %3065 = vmatprep.subr.bf16.mxu1 %v3064_v23  ;;  %v392_v39 = vld [vmem:[#allocation9 + $0x138] sm:$0xff]  ;;  %v3072_v41 = vpack.c.bf16 %v419_v37, %v418_v36  ;;  %vm1949_vm4 = vcmask 1043459   ;;  %s2660_s28 = sshll.u32 %s3720_s17, 4  ;;  %s2647_s15 = scalar_lea.sflag [#allocation8], %s3679_s30  ;;  %s4476_s28 = int_to_ptr.vmem [resolvable:$true] %s2660_s28 }
  0x65   : > { %v3716_v12 = vld [vmem:[%s354_s18] sm:$0xff]  ;;  %1405 = vperm.xlu0 %3243, %v508_v11   ;;  %2639 = vst [vmem:[%s3720_s17 + $0x18] sm:$0xff] %v3718_v13  ;;  %v509_v26 = vld [vmem:[%s360_s14 + $0x8] sm:$0xff]  ;;  %3129 = vmatprep.subr.bf16.mxu0 %v3128_v27  ;;  %v3136_v42 = vpack.c.bf16 %v392_v39, %v391_v38  ;;  %v422_v51 = vld [vmem:[#allocation9 + $0x50] sm:$0xff]  ;;  %vm1951_vm5 = vcmask 1044484   ;;  %vm1953_vm6 = vcmask 1045509  }
  0x66   : > { %2638 = vst [vmem:[%s3720_s17] sm:$0xff] %v3716_v12  ;;  %2935 = vmatprep.mubr.f32.mxu1 %v3716_v12  ;;  %v3729_v17 = vrot.slane %v3716_v12, %v3711_v9  ;;  %v421_v44 = vld [vmem:[#allocation9 + $0x48] sm:$0xff]  ;;  %v393_v45 = vld [vmem:[#allocation9 + $0x140] sm:$0xff]  ;;  %v423_v52 = vld [vmem:[#allocation9 + $0x58] sm:$0xff]  ;;  %v587_v16 = vcombine.high %v3716_v12, %v3716_v12  ;;  %vm1955_vm7 = vcmask 1046534   ;;  %vm1957_vm8 = vcmask 1047559   ;;  %s3387_s14 = scalar_lea.vmem %s4476_s28, 768 }
  0x67   : > { %3067 = vmatpush3.bf16.msra.mxu1 %v3064_v23  ;;  %v394_v46 = vld [vmem:[#allocation9 + $0x148] sm:$0xff]  ;;  %v3743_v47 = vld [vmem:[%s3683_s27] sm:$0xff]  ;;  %v3076_v49 = vpack.c.bf16 %v421_v44, %v420_v43  ;;  %v396_v54 = vld [vmem:[#allocation9 + $0x158] sm:$0xff]  ;;  %v3080_v55 = vpack.c.bf16 %v423_v52, %v422_v51  ;;  %vm1968_vm9 = vcmask 130048   ;;  %p3388_p6 = scmp.ne.s32.totalorder %s4476_s28, %s3387_s14 }
  0x68   : > { %v3733_v32 = vrot.slane %v3729_v17, %v3711_v9  ;;  %3131 = vmatpush3.bf16.msra.mxu0 %v3128_v27  ;;  %3069 = vmatprep.subr.bf16.mxu1 %v3068_v34  ;;  %v3140_v50 = vpack.c.bf16 %v394_v46, %v393_v45  ;;  %v395_v53 = vld [vmem:[#allocation9 + $0x150] sm:$0xff]  ;;  %v424_v57 = vld [vmem:[#allocation9 + $0x60] sm:$0xff]  ;;  %v425_v58 = vld [vmem:[#allocation9 + $0x68] sm:$0xff]  ;;  %v602_v62 = vcombine.high %v3729_v17, %v3729_v17 }
  0x69   : > { %1410 = vperm.xlu0 %3243, %v509_v26   ;;  %3133 = vmatprep.subr.bf16.mxu0 %v3132_v35  ;;  %v3144_v56 = vpack.c.bf16 %v396_v54, %v395_v53  ;;  %v397_v59 = vld [vmem:[#allocation9 + $0x160] sm:$0xff]  ;;  %v398_v60 = vld [vmem:[#allocation9 + $0x168] sm:$0xff]  ;;  %v3084_v61 = vpack.c.bf16 %v425_v58, %v424_v57  ;;  %v426_v0 = vld [vmem:[#allocation9 + $0x70] sm:$0xff]  ;;  %v601_v24 = vrot.slane %v587_v16, %v3711_v9  ;;  %p3389_p8 = pnand %p3388_p6, %p3620_p10 }
  0x6a   : > { %v3740_v40 = vrot.slane %v3733_v32, %v3736_v33  ;;  %v3148_v63 = vpack.c.bf16 %v398_v60, %v397_v59  ;;  %v427_v1 = vld [vmem:[#allocation9 + $0x78] sm:$0xff]  ;;  %v399_v2 = vld [vmem:[#allocation9 + $0x170] sm:$0xff]  ;;  %v624_v6 = vrot.slane %v602_v62, %v3711_v9  ;;  %v369_v11 = vld [vmem:[#allocation9 + $0x80] sm:$0xff]  ;;  %v632_v15 = vcombine.high %v3733_v32, %v3733_v32 }
  0x6b   : > { %3071 = vmatpush3.bf16.msra.mxu1 %v3068_v34  ;;  %v400_v3 = vld [vmem:[#allocation9 + $0x178] sm:$0xff]  ;;  %v3088_v5 = vpack.c.bf16 %v427_v1, %v426_v0  ;;  %v370_v14 = vld [vmem:[#allocation9 + $0x88] sm:$0xff]  ;;  %v371_v20 = vld [vmem:[#allocation9 + $0x90] sm:$0xff]  ;;  %v617_v30 = vrot.slane %v601_v24, %v3711_v9  ;;  %v603_v31 = vcombine.high %v601_v24, %v601_v24  ;;  %p3390_p12 = pneg %p3389_p8 }
  0x6c   : > { %v765_v48 = vmul.f32 %v3740_v40, %v3743_v47  ;;  %3135 = vmatpush3.bf16.msra.mxu0 %v3132_v35  ;;  %3073 = vmatprep.subr.bf16.mxu1 %v3072_v41  ;;  %v3152_v8 = vpack.c.bf16 %v400_v3, %v399_v2  ;;  %v3092_v17 = vpack.c.bf16 %v370_v14, %v369_v11  ;;  %v3755_v18 = vld [vmem:[%s3683_s27 + $0x8] sm:$0xff]  ;;  %v373_v27 = vld [vmem:[#allocation9 + $0xa0] sm:$0xff]  ;;  %v375_v36 = vld [vmem:[#allocation9 + $0xb0] sm:$0xff] }
  0x6d   : > { %3137 = vmatprep.subr.bf16.mxu0 %v3136_v42  ;;  %v692_v19 = vrot.slane %v624_v6, %v3736_v33  ;;  %v372_v21 = vld [vmem:[#allocation9 + $0x98] sm:$0xff]  ;;  %v766_v22 = vmul.f32 %v3740_v40, %v3755_v18  ;;  %v696_v23 = vrot.slane %v632_v15, %v3736_v33  ;;  %v634_v26 = vcombine.high %v624_v6, %v624_v6  ;;  %v374_v28 = vld [vmem:[#allocation9 + $0xa8] sm:$0xff]  ;;  %v377_v43 = vld [vmem:[#allocation9 + $0xc0] sm:$0xff] }
  0x6e   : > { %3005 = vmatprep.mubr.f32.mxu0 %v765_v48  ;;  %v3096_v25 = vpack.c.bf16 %v372_v21, %v371_v20  ;;  %v3100_v34 = vpack.c.bf16 %v374_v28, %v373_v27  ;;  %v376_v37 = vld [vmem:[#allocation9 + $0xb8] sm:$0xff]  ;;  %v704_v39 = vrot.slane %v617_v30, %v3736_v33  ;;  %v378_v44 = vld [vmem:[#allocation9 + $0xc8] sm:$0xff]  ;;  %v633_v46 = vcombine.high %v617_v30, %v617_v30  ;;  %v379_v51 = vld [vmem:[#allocation9 + $0xd0] sm:$0xff] }
  0x6f   : > { %3075 = vmatpush3.bf16.msra.mxu1 %v3072_v41  ;;  %v767_v12 = vmul.f32 %v692_v19, %v3743_v47  ;;  %v768_v29 = vmul.f32 %v692_v19, %v3755_v18  ;;  %v769_v32 = vmul.f32 %v696_v23, %v3743_v47  ;;  %v700_v35 = vrot.slane %v634_v26, %v3736_v33  ;;  %v380_v52 = vld [vmem:[#allocation9 + $0xd8] sm:$0xff]  ;;  %v381_v59 = vld [vmem:[#allocation9 + $0xe0] sm:$0xff]  ;;  %v382_v60 = vld [vmem:[#allocation9 + $0xe8] sm:$0xff] }
  0x70   : > { %3139 = vmatpush3.bf16.msra.mxu0 %v3136_v42  ;;  %3077 = vmatprep.subr.bf16.mxu1 %v3076_v49  ;;  %v770_v38 = vmul.f32 %v696_v23, %v3755_v18  ;;  %v3104_v41 = vpack.c.bf16 %v376_v37, %v375_v36  ;;  %v631_v42 = vrot.slane %v603_v31, %v3711_v9  ;;  %v383_v3 = vld [vmem:[#allocation9 + $0xf0] sm:$0xff] }
  0x71   : > { %3141 = vmatprep.subr.bf16.mxu0 %v3140_v50  ;;  %v771_v40 = vmul.f32 %v700_v35, %v3743_v47  ;;  %v772_v45 = vmul.f32 %v700_v35, %v3755_v18  ;;  %v773_v48 = vmul.f32 %v704_v39, %v3743_v47  ;;  %v774_v53 = vmul.f32 %v704_v39, %v3755_v18 }
  0x72   : > { %v712_v54 = vrot.slane %v633_v46, %v3736_v33  ;;  %v3112_v57 = vpack.c.bf16 %v380_v52, %v379_v51  ;;  %v635_v58 = vcombine.high %v631_v42, %v631_v42  ;;  %v3116_v1 = vpack.c.bf16 %v382_v60, %v381_v59 }
  0x73   : > { %3079 = vmatpush3.bf16.msra.mxu1 %v3076_v49  ;;  %v3108_v49 = vpack.c.bf16 %v378_v44, %v377_v43 }
  0x74   : > { %3143 = vmatpush3.bf16.msra.mxu0 %v3140_v50  ;;  %3081 = vmatprep.subr.bf16.mxu1 %v3080_v55  ;;  %v708_v50 = vrot.slane %v631_v42, %v3736_v33  ;;  %v777_v0 = vmul.f32 %v712_v54, %v3743_v47  ;;  %v716_v2 = vrot.slane %v635_v58, %v3736_v33 }
  0x75   : > { %3145 = vmatprep.subr.bf16.mxu0 %v3144_v56  ;;  %v778_v6 = vmul.f32 %v712_v54, %v3755_v18 }
  0x76   : > { %v779_v11 = vmul.f32 %v716_v2, %v3743_v47  ;;  %v780_v16 = vmul.f32 %v716_v2, %v3755_v18 }
  0x77   : > { %3083 = vmatpush3.bf16.msra.mxu1 %v3080_v55  ;;  %v643_v55 = vrot.slane %v3718_v13, %v3711_v9 }
  0x78   : > { %3147 = vmatpush3.bf16.msra.mxu0 %v3144_v56  ;;  %3085 = vmatprep.subr.bf16.mxu1 %v3084_v61  ;;  %v775_v56 = vmul.f32 %v708_v50, %v3743_v47 }
  0x79   : > { %3149 = vmatprep.subr.bf16.mxu0 %v3148_v63  ;;  %v659_v62 = vrot.slane %v643_v55, %v3711_v9 }
  0x7b   : > { %3087 = vmatpush3.bf16.msra.mxu1 %v3084_v61  ;;  %v776_v61 = vmul.f32 %v708_v50, %v3755_v18  ;;  %v681_v21 = vcombine.high %v659_v62, %v659_v62  ;;  %v2806_v50 = vld [vmem:[%s366_s9] ss:$0 sm:$0xff] }
  0x7c   : > { %3151 = vmatpush3.bf16.msra.mxu0 %v3148_v63  ;;  %3089 = vmatprep.subr.bf16.mxu1 %v3088_v5  ;;  %v651_v63 = vcombine.high %v643_v55, %v643_v55  ;;  %v3824_v55 = vsub.s32 2, %v3695_v4 }
  0x7d   : > { %3153 = vmatprep.subr.bf16.mxu0 %v3152_v8  ;;  %v728_v24 = vrot.slane %v681_v21, %v3736_v33 }
  0x7e   : > { %v673_v15 = vrot.slane %v651_v63, %v3711_v9 }
  0x7f   : > { %3091 = vmatpush3.bf16.msra.mxu1 %v3088_v5  ;;  %v384_v5 = vld [vmem:[#allocation9 + $0xf8] sm:$0xff]  ;;  %v785_v26 = vmul.f32 %v728_v24, %v3743_v47  ;;  %v786_v30 = vmul.f32 %v728_v24, %v3755_v18 }
  0x80   : > { %3155 = vmatpush3.bf16.msra.mxu0 %v3152_v8  ;;  %3093 = vmatprep.subr.bf16.mxu1 %v3092_v17  ;;  %v720_v8 = vrot.slane %v659_v62, %v3736_v33  ;;  %v3120_v14 = vpack.c.bf16 %v384_v5, %v383_v3  ;;  %v724_v20 = vrot.slane %v673_v15, %v3736_v33  ;;  %v3840_v3 = vsub.s32 4, %v3695_v4 }
  0x82   : > { %2936 = vmatmul.mubr.f32.vlgmr.msra.gmra.mrb[0].mxu1 %v3718_v13  ;;  %v781_v19 = vmul.f32 %v720_v8, %v3743_v47  ;;  %v783_v23 = vmul.f32 %v724_v20, %v3743_v47 }
  0x83   : > { %3006 = vmatmul.mubr.f32.vlgmr.msra.gmra.mrb[0].mxu0 %v766_v22  ;;  %3095 = vmatpush3.bf16.msra.mxu1 %v3092_v17  ;;  %v636_v17 = vcombine.high %v3718_v13, %v3718_v13  ;;  %v782_v22 = vmul.f32 %v720_v8, %v3755_v18  ;;  %v784_v13 = vmul.f32 %v724_v20, %v3755_v18  ;;  %v3845_v8 = vsub.s32 5, %v3695_v4 }
  0x84   : > { %3008 = vmatprep.mubr.f32.mxu0 %v767_v12  ;;  %3097 = vmatprep.subr.bf16.mxu1 %v3096_v25  ;;  %v683_v12 = vcombine.high %v673_v15, %v673_v15  ;;  %v3850_v15 = vsub.s32 6, %v3695_v4 }
  0x85   : > { %2970 = vmatprep.mubr.f32.mxu1 %v3743_v47 }
  0x86   : > { %v732_v27 = vrot.slane %v683_v12, %v3736_v33 }
  0x87   : > { %3009 = vmatmul.mubr.f32.gmra.mrb[2].mxu0 %v768_v29  ;;  %3099 = vmatpush3.bf16.msra.mxu1 %v3096_v25  ;;  %v650_v25 = vrot.slane %v636_v17, %v3711_v9 }
  0x88   : > { %3011 = vmatprep.mubr.f32.mxu0 %v769_v32  ;;  %3101 = vmatprep.subr.bf16.mxu1 %v3100_v34  ;;  %v787_v31 = vmul.f32 %v732_v27, %v3743_v47  ;;  %v788_v35 = vmul.f32 %v732_v27, %v3755_v18 }
  0x89   : > { %v666_v28 = vrot.slane %v650_v25, %v3711_v9  ;;  %v652_v29 = vcombine.high %v650_v25, %v650_v25 }
  0x8b   : > { %3012 = vmatmul.mubr.f32.gmra.mrb[4].mxu0 %v770_v38  ;;  %3103 = vmatpush3.bf16.msra.mxu1 %v3100_v34  ;;  %v736_v32 = vrot.slane %v666_v28, %v3736_v33  ;;  %v680_v34 = vrot.slane %v652_v29, %v3711_v9  ;;  %v682_v38 = vcombine.high %v666_v28, %v666_v28 }
  0x8c   : > { %3014 = vmatprep.mubr.f32.mxu0 %v771_v40  ;;  %3105 = vmatprep.subr.bf16.mxu1 %v3104_v41 }
  0x8d   : > { %v789_v36 = vmul.f32 %v736_v32, %v3743_v47  ;;  %v740_v37 = vrot.slane %v680_v34, %v3736_v33  ;;  %v790_v39 = vmul.f32 %v736_v32, %v3755_v18  ;;  %v684_v42 = vcombine.high %v680_v34, %v680_v34 }
  0x8f   : > { %3015 = vmatmul.mubr.f32.gmra.mrb[6].mxu0 %v772_v45  ;;  %3107 = vmatpush3.bf16.msra.mxu1 %v3104_v41  ;;  %v791_v40 = vmul.f32 %v740_v37, %v3743_v47  ;;  %v744_v41 = vrot.slane %v682_v38, %v3736_v33  ;;  %v792_v43 = vmul.f32 %v740_v37, %v3755_v18 }
  0x90   : > { %3017 = vmatprep.mubr.f32.mxu0 %v773_v48  ;;  %3109 = vmatprep.subr.bf16.mxu1 %v3108_v49  ;;  %v748_v45 = vrot.slane %v684_v42, %v3736_v33 }
  0x91   : > { %v793_v44 = vmul.f32 %v744_v41, %v3743_v47  ;;  %v794_v46 = vmul.f32 %v744_v41, %v3755_v18 }
  0x92   : > { %v795_v48 = vmul.f32 %v748_v45, %v3743_v47 }
  0x93   : > { %3018 = vmatmul.mubr.f32.gmra.mrb[8].mxu0 %v774_v53  ;;  %3111 = vmatpush3.bf16.msra.mxu1 %v3108_v49  ;;  %v796_v49 = vmul.f32 %v748_v45, %v3755_v18 }
  0x94   : > { %3020 = vmatprep.mubr.f32.mxu0 %v775_v56  ;;  %3113 = vmatprep.subr.bf16.mxu1 %v3112_v57  ;;  %v3827_v56 = vsub.s32 1, %v3695_v4 }
  0x97   : > { %3021 = vmatmul.mubr.f32.gmra.mrb[10].mxu0 %v776_v61  ;;  %3115 = vmatpush3.bf16.msra.mxu1 %v3112_v57 }
  0x98   : > { %3023 = vmatprep.mubr.f32.mxu0 %v777_v0  ;;  %3117 = vmatprep.subr.bf16.mxu1 %v3116_v1  ;;  %v3835_v0 = vsub.s32 3, %v3695_v4 }
  0x9b   : > { %3024 = vmatmul.mubr.f32.gmra.mrb[12].mxu0 %v778_v6  ;;  %3119 = vmatpush3.bf16.msra.mxu1 %v3116_v1 }
  0x9c   : > { %3026 = vmatprep.mubr.f32.mxu0 %v779_v11  ;;  %3121 = vmatprep.subr.bf16.mxu1 %v3120_v14 }
  0x9f   : > { %3027 = vmatmul.mubr.f32.gmra.mrb[14].mxu0 %v780_v16  ;;  %3123 = vmatpush3.bf16.msra.mxu1 %v3120_v14 }
  0xa0   : > { %3029 = vmatprep.mubr.f32.mxu0 %v781_v19  ;;  %v3855_v19 = vsub.s32 7, %v3695_v4 }
  0xa2   : > { %2971 = vmatmul.mubr.f32.vlgmr.msra.gmra.mrb[2].mxu1 %v3755_v18 }
  0xa3   : > { %3030 = vmatmul.mubr.f32.gmra.mrb[16].mxu0 %v782_v22 }
  0xa4   : > { %3032 = vmatprep.mubr.f32.mxu0 %v783_v23 }
  0xa7   : > { %3033 = vmatmul.mubr.f32.gmra.mrb[18].mxu0 %v784_v13 }
  0xa8   : > { %3035 = vmatprep.mubr.f32.mxu0 %v785_v26 }
  0xab   : > { %3036 = vmatmul.mubr.f32.gmra.mrb[20].mxu0 %v786_v30 }
  0xac   : > { %3038 = vmatprep.mubr.f32.mxu0 %v787_v31 }
  0xaf   : > { %3039 = vmatmul.mubr.f32.gmra.mrb[22].mxu0 %v788_v35 }
  0xb0   : > { %3041 = vmatprep.mubr.f32.mxu0 %v789_v36 }
  0xb3   : > { %3042 = vmatmul.mubr.f32.gmra.mrb[24].mxu0 %v790_v39 }
  0xb4   : > { %3044 = vmatprep.mubr.f32.mxu0 %v791_v40 }
  0xb7   : > { %3045 = vmatmul.mubr.f32.gmra.mrb[26].mxu0 %v792_v43 }
  0xb8   : > { %3047 = vmatprep.mubr.f32.mxu0 %v793_v44 }
  0xbb   : > { %3048 = vmatmul.mubr.f32.gmra.mrb[28].mxu0 %v794_v46 }
  0xbc   : > { %3050 = vmatprep.mubr.f32.mxu0 %v795_v48 }
  0xbf   : > { %3051 = vmatmul.mubr.f32.gmra.mrb[30].mxu0 %v796_v49 }
  0xe4   : > { %v1406_v51 = vpop.permute.xlu0 %1405 }
  0xe5   : > { %v1419_v52 = vmul.f32 %v2806_v50, %v1406_v51 }
  0xe7   : > { %v1421_v53 = vsub.f32 1.0, %v1419_v52 }
  0xe8   : > { %v1411_v47 = vpop.permute.xlu0 %1410 }
  0xe9   : > { %v1423_v54 = vmul.f32 -1e+30, %v1421_v53  ;;  %v1420_v57 = vmul.f32 %v2806_v50, %v1411_v47 }
  0xeb   : > { %v1430_v18 = vrot.slane %v1423_v54, %v3736_v33  ;;  %v1422_v58 = vsub.f32 1.0, %v1420_v57  ;;  %v1452_v59 = vrot.slane %v1423_v54, %v3824_v55  ;;  %v1441_v60 = vrot.slane %v1423_v54, %v3827_v56 }
  0xec   : > { %v1463_v1 = vrot.slane %v1423_v54, %v3835_v0  ;;  %v1474_v5 = vrot.slane %v1423_v54, %v3840_v3  ;;  %v1485_v11 = vrot.slane %v1423_v54, %v3845_v8  ;;  %v1496_v16 = vrot.slane %v1423_v54, %v3850_v15 }
  0xed   : > { %1436 = vbcast.lane.b32.xlu0 %v1430_v18, 264  ;;  %1432 = vbcast.lane.b32.xlu1 %v1430_v18, 256  ;;  %v1424_v61 = vmul.f32 -1e+30, %v1422_v58  ;;  %v1507_v20 = vrot.slane %v1423_v54, %v3855_v19 }
  0xef   : > { %v1518_v62 = vrot.slane %v1424_v61, %v3736_v33  ;;  %v1529_v63 = vrot.slane %v1424_v61, %v3827_v56  ;;  %v1540_v2 = vrot.slane %v1424_v61, %v3824_v55  ;;  %v1551_v6 = vrot.slane %v1424_v61, %v3835_v0 }
  0xf0   : > { %v1562_v14 = vrot.slane %v1424_v61, %v3840_v3  ;;  %v1573_v17 = vrot.slane %v1424_v61, %v3845_v8  ;;  %v1584_v21 = vrot.slane %v1424_v61, %v3850_v15  ;;  %v1595_v22 = vrot.slane %v1424_v61, %v3855_v19 }
  0xf1   : > { %1454 = vbcast.lane.b32.xlu0 %v1452_v59, 256  ;;  %1443 = vbcast.lane.b32.xlu1 %v1441_v60, 256 }
  0xf5   : > { %1520 = vbcast.lane.b32.xlu0 %v1518_v62, 256  ;;  %1447 = vbcast.lane.b32.xlu1 %v1441_v60, 264 }
  0xf9   : > { %1531 = vbcast.lane.b32.xlu0 %v1529_v63, 256  ;;  %1458 = vbcast.lane.b32.xlu1 %v1452_v59, 264 }
  0xfd   : > { %1465 = vbcast.lane.b32.xlu0 %v1463_v1, 256  ;;  %1524 = vbcast.lane.b32.xlu1 %v1518_v62, 264 }
 0x101   : > { %1542 = vbcast.lane.b32.xlu0 %v1540_v2, 256  ;;  %1535 = vbcast.lane.b32.xlu1 %v1529_v63, 264 }
 0x105   : > { %1476 = vbcast.lane.b32.xlu0 %v1474_v5, 256  ;;  %1469 = vbcast.lane.b32.xlu1 %v1463_v1, 264 }
 0x109   : > { %1553 = vbcast.lane.b32.xlu0 %v1551_v6, 256  ;;  %1546 = vbcast.lane.b32.xlu1 %v1540_v2, 264 }
 0x10d   : > { %1487 = vbcast.lane.b32.xlu0 %v1485_v11, 256  ;;  %1480 = vbcast.lane.b32.xlu1 %v1474_v5, 264 }
 0x111   : > { %1564 = vbcast.lane.b32.xlu0 %v1562_v14, 256  ;;  %1557 = vbcast.lane.b32.xlu1 %v1551_v6, 264 }
 0x115   : > { %1498 = vbcast.lane.b32.xlu0 %v1496_v16, 256  ;;  %1491 = vbcast.lane.b32.xlu1 %v1485_v11, 264 }
 0x119   : > { %1575 = vbcast.lane.b32.xlu0 %v1573_v17, 256  ;;  %1568 = vbcast.lane.b32.xlu1 %v1562_v14, 264 }
 0x11d   : > { %1509 = vbcast.lane.b32.xlu0 %v1507_v20, 256  ;;  %1502 = vbcast.lane.b32.xlu1 %v1496_v16, 264 }
 0x121   : > { %1586 = vbcast.lane.b32.xlu0 %v1584_v21, 256  ;;  %1579 = vbcast.lane.b32.xlu1 %v1573_v17, 264 }
 0x125   : > { %1597 = vbcast.lane.b32.xlu0 %v1595_v22, 256  ;;  %1513 = vbcast.lane.b32.xlu1 %v1507_v20, 264 }
 0x129   : > { %1590 = vbcast.lane.b32.xlu1 %v1584_v21, 264 }
 0x12d   : > { %1601 = vbcast.lane.b32.xlu1 %v1595_v22, 264 }
 0x155   : > { %v2937_v23 = vpop.f32.mrb[0].mxu1 }
 0x156   : > { %v494_v24 = vpop.f32.mrb[1].mxu1  ;;  %v3860_v4 = vpop.f32.mrb[0].mxu0  ;;  %v1082_v32 = vrot.slane %v2937_v23, %v3711_v9  ;;  %v1075_v38 = vcombine.high %v2937_v23, %v2937_v23 }
 0x157   : > { %v3862_v12 = vpop.f32.mrb[1].mxu0  ;;  %v1026_v28 = vcombine.high %v494_v24, %v494_v24  ;;  %v1033_v34 = vrot.slane %v494_v24, %v3711_v9 }
 0x158   : > { %v1090_v39 = vcombine.high %v1082_v32, %v1082_v32  ;;  %v1098_v42 = vrot.slane %v1082_v32, %v3711_v9  ;;  %v1089_v46 = vrot.slane %v1075_v38, %v3711_v9 }
 0x159   : > { %v1040_v31 = vrot.slane %v1026_v28, %v3711_v9  ;;  %v1041_v40 = vcombine.high %v1033_v34, %v1033_v34  ;;  %v1049_v44 = vrot.slane %v1033_v34, %v3711_v9 }
 0x15a   : > { %v3864_v25 = vpop.f32.mrb[2].mxu0  ;;  %v1112_v48 = vrot.slane %v1090_v39, %v3711_v9  ;;  %v1120_v51 = vcombine.high %v1098_v42, %v1098_v42  ;;  %v1091_v57 = vcombine.high %v1089_v46, %v1089_v46  ;;  %v3899_v59 = vrot.slane %v1089_v46, %v3711_v9 }
 0x15b   : > { %v3866_v13 = vpop.f32.mrb[3].mxu0  ;;  %v1042_v37 = vcombine.high %v1040_v31, %v1040_v31  ;;  %v1063_v49 = vrot.slane %v1041_v40, %v3711_v9  ;;  %v1056_v53 = vrot.slane %v1040_v31, %v3711_v9  ;;  %v1071_v54 = vcombine.high %v1049_v44, %v1049_v44 }
 0x15c   : > { %v1122_v58 = vcombine.high %v1112_v48, %v1112_v48  ;;  %v3902_v61 = vrot.slane %v1049_v44, %v3736_v33  ;;  %v1159_v63 = vrot.slane %v1098_v42, %v3736_v33  ;;  %v1163_v1 = vrot.slane %v1112_v48, %v3736_v33 }
 0x15d   : > { %v1070_v45 = vrot.slane %v1042_v37, %v3711_v9  ;;  %v1073_v18 = vcombine.high %v1063_v49, %v1063_v49  ;;  %v1167_v2 = vrot.slane %v1120_v51, %v3736_v33  ;;  %v1072_v5 = vcombine.high %v1056_v53, %v1056_v53 }
 0x15e   : > { %v3868_v26 = vpop.f32.mrb[4].mxu0  ;;  %v3908_v6 = vrot.slane %v1063_v49, %v3736_v33  ;;  %v3911_v11 = vrot.slane %v1071_v54, %v3736_v33  ;;  %v3915_v16 = vrot.slane %v1056_v53, %v3736_v33  ;;  %v1171_v21 = vrot.slane %v1122_v58, %v3736_v33 }
 0x15f   : > { %v3870_v27 = vpop.f32.mrb[5].mxu0  ;;  %v1074_v47 = vcombine.high %v1070_v45, %v1070_v45  ;;  %v3920_v20 = vrot.slane %v1073_v18, %v3736_v33  ;;  %v3924_v22 = vrot.slane %v1091_v57, %v3711_v9  ;;  %v1175_v58 = vrot.slane %v3899_v59, %v3736_v33 }
 0x161   : > { %v1155_v14 = vrot.slane %v1074_v47, %v3736_v33 }
 0x162   : > { %v3872_v29 = vpop.f32.mrb[6].mxu0 }
 0x163   : > { %v3874_v30 = vpop.f32.mrb[7].mxu0 }
 0x166   : > { %v3879_v35 = vpop.f32.mrb[8].mxu0 }
 0x167   : > { %v3881_v36 = vpop.f32.mrb[9].mxu0 }
 0x16a   : > { %v3883_v41 = vpop.f32.mrb[10].mxu0 }
 0x16b   : > { %v3886_v43 = vpop.f32.mrb[11].mxu0 }
 0x16e   : > { %v3893_v50 = vpop.f32.mrb[12].mxu0 }
 0x16f   : > { %v3895_v52 = vpop.f32.mrb[13].mxu0 }
 0x172   : > { %v3028_v60 = vpop.f32.mrb[14].mxu0 }
 0x173   : > { %v933_v62 = vpop.f32.mrb[15].mxu0 }
 0x175   : > { %v3917_v17 = vpop.f32.mrb[2].mxu1 }
 0x176   : > { %v1219_v23 = vadd.f32 %v3917_v17, %v1155_v14  ;;  %v3927_v24 = vpop.f32.mrb[3].mxu1  ;;  %v1221_v28 = vadd.f32 %v3917_v17, %v1159_v63  ;;  %v1223_v31 = vadd.f32 %v3917_v17, %v1163_v1  ;;  %v1225_v32 = vadd.f32 %v3917_v17, %v1167_v2  ;;  %v3031_v37 = vpop.f32.mrb[16].mxu0 }
 0x177   : > { %v1218_v34 = vadd.f32 %v1155_v14, %v3927_v24  ;;  %v1220_v38 = vadd.f32 %v1159_v63, %v3927_v24  ;;  %v1222_v39 = vadd.f32 %v1163_v1, %v3927_v24  ;;  %v1224_v9 = vadd.f32 %v1167_v2, %v3927_v24  ;;  %v943_v44 = vpop.f32.mrb[17].mxu0  ;;  %v3962_v1 = vld [vmem:[%s4531_s5] ss:$0 sm:$0xff] }
 0x178   : > { %v3936_v40 = vadd.f32 %v3028_v60, %v1219_v23  ;;  %v3938_v42 = vadd.f32 %v3031_v37, %v1221_v28  ;;  %v1211_v46 = vadd.f32 %v3917_v17, %v3920_v20  ;;  %v1205_v48 = vadd.f32 %v3917_v17, %v3902_v61 }
 0x179   : > { %v3944_v49 = vadd.f32 %v1218_v34, %v933_v62  ;;  %v3946_v51 = vadd.f32 %v1220_v38, %v943_v44  ;;  %v1227_v53 = vadd.f32 %v3917_v17, %v1171_v21  ;;  %v1226_v54 = vadd.f32 %v1171_v21, %v3927_v24 }
 0x17a   : > { %v3034_v47 = vpop.f32.mrb[18].mxu0  ;;  %v1243_v57 = vadd.f32 %v3872_v29, %v1211_v46  ;;  %v1237_v18 = vadd.f32 %v3860_v4, %v1205_v48  ;;  %v3955_v60 = vrot.slane %v1070_v45, %v3736_v33  ;;  %v1213_v2 = vadd.f32 %v3917_v17, %v3915_v16 }
 0x17b   : > { %v3957_v63 = vadd.f32 %v3034_v47, %v1223_v31  ;;  %v953_v62 = vpop.f32.mrb[19].mxu0  ;;  %v3967_v29 = vrot.slane %v1072_v5, %v3736_v33  ;;  %v1121_v4 = vcombine.high %v3899_v59, %v3899_v59  ;;  %v1207_v23 = vadd.f32 %v3917_v17, %v3908_v6 }
 0x17c   : > { %v3971_v14 = vadd.f32 %v1222_v39, %v953_v62  ;;  %v1275_v45 = vmax.f32 %v1243_v57, 0.0  ;;  %v1269_v21 = vmax.f32 %v1237_v18, 0.0  ;;  %v1245_v28 = vadd.f32 %v3879_v35, %v1213_v2 }
 0x17d   : > { %v1229_v31 = vadd.f32 %v3917_v17, %v1175_v58  ;;  %v1228_v34 = vadd.f32 %v1175_v58, %v3927_v24  ;;  %v1179_v5 = vrot.slane %v3924_v22, %v3736_v33  ;;  %v1239_v39 = vadd.f32 %v3864_v25, %v1207_v23 }
 0x17e   : > { %v3037_v37 = vpop.f32.mrb[20].mxu0  ;;  %v1314_v38 = vmul.f32 %v3962_v1, %v1275_v45  ;;  %v1308_v59 = vmul.f32 %v3962_v1, %v1269_v21  ;;  %v1123_v44 = vcombine.high %v3924_v22, %v3924_v22  ;;  %v1277_v48 = vmax.f32 %v1245_v28, 0.0 }
 0x17f   : > { %v3985_v46 = vadd.f32 %v3037_v37, %v1225_v32  ;;  %v963_v35 = vpop.f32.mrb[21].mxu0  ;;  %v1215_v47 = vadd.f32 %v3917_v17, %v3955_v60  ;;  %v1209_v57 = vadd.f32 %v3917_v17, %v3911_v11  ;;  %v1271_v58 = vmax.f32 %v1239_v39, 0.0 }
 0x180   : > { %v3991_v18 = vadd.f32 %v1224_v9, %v963_v35  ;;  %1353 = vadd.xlane.f32.xlu0 %v1314_v38  ;;  %1341 = vadd.xlane.f32.xlu1 %v1308_v59  ;;  %v1231_v25 = vadd.f32 %v3917_v17, %v1179_v5  ;;  %v1230_v62 = vadd.f32 %v1179_v5, %v3927_v24  ;;  %v1285_v35 = vmax.f32 %v3938_v42, 0.0 }
 0x181   : > { %v1247_v22 = vadd.f32 %v3883_v41, %v1215_v47  ;;  %v1241_v32 = vadd.f32 %v3868_v26, %v1209_v57  ;;  %v1183_v2 = vrot.slane %v1121_v4, %v3736_v33  ;;  %v1316_v21 = vmul.f32 %v3962_v1, %v1277_v48 }
 0x182   : > { %v3040_v45 = vpop.f32.mrb[22].mxu0  ;;  %v1310_v23 = vmul.f32 %v3962_v1, %v1271_v58  ;;  %v1217_v9 = vadd.f32 %v3917_v17, %v3967_v29  ;;  %v1187_v28 = vrot.slane %v1123_v44, %v3736_v33  ;;  %v1204_v57 = vadd.f32 %v3902_v61, %v3927_v24 }
 0x183   : > { %v4003_v37 = vadd.f32 %v3040_v45, %v1227_v53  ;;  %v973_v38 = vpop.f32.mrb[23].mxu0  ;;  %v1279_v5 = vmax.f32 %v1247_v22, 0.0  ;;  %v1273_v59 = vmax.f32 %v1241_v32, 0.0  ;;  %v1233_v41 = vadd.f32 %v3917_v17, %v1183_v2 }
 0x184   : > { %v4006_v26 = vadd.f32 %v1226_v54, %v973_v38  ;;  %1357 = vadd.xlane.f32.xlu0 %v1316_v21  ;;  %1345 = vadd.xlane.f32.xlu1 %v1310_v23  ;;  %v1249_v4 = vadd.f32 %v3893_v50, %v1217_v9  ;;  %v1232_v39 = vadd.f32 %v1183_v2, %v3927_v24  ;;  %v1283_v61 = vmax.f32 %v3936_v40, 0.0 }
 0x185   : > { %v1318_v48 = vmul.f32 %v3962_v1, %v1279_v5  ;;  %v1312_v53 = vmul.f32 %v3962_v1, %v1273_v59  ;;  %v1235_v54 = vadd.f32 %v3917_v17, %v1187_v28  ;;  %v1234_v50 = vadd.f32 %v1187_v28, %v3927_v24 }
 0x186   : > { %v3043_v44 = vpop.f32.mrb[24].mxu0  ;;  %v1281_v47 = vmax.f32 %v1249_v4, 0.0  ;;  %v1206_v32 = vadd.f32 %v3908_v6, %v3927_v24  ;;  %v1208_v42 = vadd.f32 %v3911_v11, %v3927_v24  ;;  %v1236_v45 = vadd.f32 %v1204_v57, %v3862_v12 }
 0x187   : > { %v4016_v58 = vadd.f32 %v3043_v44, %v1229_v31  ;;  %v983_v22 = vpop.f32.mrb[25].mxu0  ;;  %v1324_v9 = vmul.f32 %v3962_v1, %v1285_v35  ;;  %v1210_v11 = vadd.f32 %v3920_v20, %v3927_v24  ;;  %v1322_v12 = vmul.f32 %v3962_v1, %v1283_v61 }
 0x188   : > { %v1260_v2 = vadd.f32 %v1228_v34, %v983_v22  ;;  %1361 = vadd.xlane.f32.xlu0 %v1318_v48  ;;  %1349 = vadd.xlane.f32.xlu1 %v1312_v53  ;;  %v1238_v17 = vadd.f32 %v1206_v32, %v3866_v13  ;;  %v1240_v31 = vadd.f32 %v1208_v42, %v3870_v27  ;;  %v1268_v6 = vmax.f32 %v1236_v45, 0.0 }
 0x189   : > { %v1320_v23 = vmul.f32 %v3962_v1, %v1281_v47  ;;  %v1242_v27 = vadd.f32 %v1210_v11, %v3874_v30  ;;  %v1212_v4 = vadd.f32 %v3915_v16, %v3927_v24  ;;  %v1216_v20 = vadd.f32 %v3967_v29, %v3927_v24 }
 0x18a   : > { %v3046_v21 = vpop.f32.mrb[26].mxu0  ;;  %v1270_v40 = vmax.f32 %v1238_v17, 0.0  ;;  %v1272_v13 = vmax.f32 %v1240_v31, 0.0  ;;  %v1307_v59 = vmul.f32 %v3962_v1, %v1268_v6  ;;  %v1284_v53 = vmax.f32 %v3946_v51, 0.0 }
 0x18b   : > { %v1263_v28 = vadd.f32 %v3046_v21, %v1231_v25  ;;  %v993_v38 = vpop.f32.mrb[27].mxu0  ;;  %v1214_v25 = vadd.f32 %v3955_v60, %v3927_v24  ;;  %v1244_v44 = vadd.f32 %v1212_v4, %v3881_v36  ;;  %v1289_v47 = vmax.f32 %v3985_v46, 0.0 }
 0x18c   : > { %v1262_v34 = vadd.f32 %v1230_v62, %v993_v38  ;;  %1365 = vadd.xlane.f32.xlu0 %v1320_v23  ;;  %1373 = vadd.xlane.f32.xlu1 %v1324_v9  ;;  %v1292_v16 = vmax.f32 %v1260_v2, 0.0  ;;  %v1248_v57 = vadd.f32 %v1216_v20, %v3895_v52  ;;  %v1309_v24 = vmul.f32 %v3962_v1, %v1270_v40 }
 0x18d   : > { %v1246_v30 = vadd.f32 %v1214_v25, %v3886_v43  ;;  %v1311_v29 = vmul.f32 %v3962_v1, %v1272_v13  ;;  %v1291_v36 = vmax.f32 %v4003_v37, 0.0  ;;  %v1328_v43 = vmul.f32 %v3962_v1, %v1289_v47 }
 0x18e   : > { %v3049_v5 = vpop.f32.mrb[28].mxu0  ;;  %v1294_v60 = vmax.f32 %v1262_v34, 0.0  ;;  %v1323_v51 = vmul.f32 %v3962_v1, %v1284_v53  ;;  %v1331_v52 = vmul.f32 %v3962_v1, %v1292_v16  ;;  %v1274_v2 = vmax.f32 %v1242_v27, 0.0  ;;  %v4064_v27 = vpop.permute.xlu1 %1432 }
 0x18f   : > { %v1265_v62 = vadd.f32 %v3049_v5, %v1233_v41  ;;  %v1003_v35 = vpop.f32.mrb[29].mxu0  ;;  %v1330_v37 = vmul.f32 %v3962_v1, %v1291_v36  ;;  %v1276_v31 = vmax.f32 %v1244_v44, 0.0  ;;  %v1295_v21 = vmax.f32 %v1263_v28, 0.0 }
 0x190   : > { %v1264_v48 = vadd.f32 %v1232_v39, %v1003_v35  ;;  %1369 = vadd.xlane.f32.xlu0 %v1322_v12  ;;  %1339 = vadd.xlane.f32.xlu1 %v1307_v59  ;;  %v1333_v45 = vmul.f32 %v3962_v1, %v1294_v60  ;;  %v1313_v17 = vmul.f32 %v3962_v1, %v1274_v2  ;;  %v1278_v6 = vmax.f32 %v1246_v30, 0.0 }
 0x191   : > { %v1315_v9 = vmul.f32 %v3962_v1, %v1276_v31  ;;  %v1297_v38 = vmax.f32 %v1265_v62, 0.0  ;;  %v1334_v11 = vmul.f32 %v3962_v1, %v1295_v21  ;;  %v1280_v34 = vmax.f32 %v1248_v57, 0.0 }
 0x192   : > { %v1296_v22 = vmax.f32 %v1264_v48, 0.0  ;;  %v3052_v32 = vpop.f32.mrb[30].mxu0  ;;  %v1282_v12 = vmax.f32 %v3944_v49, 0.0  ;;  %v1287_v5 = vmax.f32 %v3957_v63, 0.0  ;;  %v1286_v25 = vmax.f32 %v3971_v14, 0.0  ;;  %v4071_v20 = vpop.permute.xlu1 %1443 }
 0x193   : > { %v1267_v41 = vadd.f32 %v3052_v32, %v1235_v54  ;;  %v1013_v39 = vpop.f32.mrb[31].mxu0  ;;  %v1336_v28 = vmul.f32 %v3962_v1, %v1297_v38  ;;  %v1319_v13 = vmul.f32 %v3962_v1, %v1280_v34  ;;  %v1288_v62 = vmax.f32 %v3991_v18, 0.0  ;;  %v1437_v48 = vpop.permute.xlu0 %1436 }
 0x194   : > { %v1266_v42 = vadd.f32 %v1234_v50, %v1013_v39  ;;  %1343 = vadd.xlane.f32.xlu0 %v1309_v24  ;;  %1347 = vadd.xlane.f32.xlu1 %v1311_v29  ;;  %v1335_v61 = vmul.f32 %v3962_v1, %v1296_v22  ;;  %v1293_v50 = vmax.f32 %v4016_v58, 0.0  ;;  %v1317_v58 = vmul.f32 %v3962_v1, %v1278_v6 }
 0x195   : > { %v1299_v40 = vmax.f32 %v1267_v41, 0.0  ;;  %v1321_v4 = vmul.f32 %v3962_v1, %v1282_v12  ;;  %v1326_v49 = vmul.f32 %v3962_v1, %v1287_v5  ;;  %v1325_v35 = vmul.f32 %v3962_v1, %v1286_v25 }
 0x196   : > { %v1298_v46 = vmax.f32 %v1266_v42, 0.0  ;;  %v1332_v23 = vmul.f32 %v3962_v1, %v1293_v50  ;;  %v1448_v63 = vpop.permute.xlu1 %1447  ;;  %v1290_v44 = vmax.f32 %v4006_v26, 0.0  ;;  %v1327_v30 = vmul.f32 %v3962_v1, %v1288_v62 }
 0x197   : > { %v1338_v59 = vmul.f32 %v3962_v1, %v1299_v40  ;;  %v4078_v14 = vpop.permute.xlu0 %1454 }
 0x198   : > { %1381 = vadd.xlane.f32.xlu0 %v1328_v43  ;;  %1371 = vadd.xlane.f32.xlu1 %v1323_v51  ;;  %v1337_v54 = vmul.f32 %v3962_v1, %v1298_v46  ;;  %v1329_v53 = vmul.f32 %v3962_v1, %v1290_v44 }
 0x19a   : > { %v1459_v47 = vpop.permute.xlu1 %1458 }
 0x19b   : > { %v4080_v16 = vpop.permute.xlu0 %1520 }
 0x19c   : > { %1385 = vadd.xlane.f32.xlu0 %v1330_v37  ;;  %1351 = vadd.xlane.f32.xlu1 %v1313_v17 }
 0x19e   : > { %v1525_v18 = vpop.permute.xlu1 %1524 }
 0x19f   : > { %v4082_v57 = vpop.permute.xlu0 %1531 }
 0x1a0   : > { %1389 = vadd.xlane.f32.xlu0 %v1332_v23  ;;  %1355 = vadd.xlane.f32.xlu1 %v1315_v9 }
 0x1a2   : > { %v4084_v60 = vpop.permute.xlu1 %1535 }
 0x1a3   : > { %v1466_v26 = vpop.permute.xlu0 %1465 }
 0x1a4   : > { %1393 = vadd.xlane.f32.xlu0 %v1334_v11  ;;  %1359 = vadd.xlane.f32.xlu1 %v1317_v58 }
 0x1a6   : > { %v1470_v22 = vpop.permute.xlu1 %1469 }
 0x1a7   : > { %v4086_v32 = vpop.permute.xlu0 %1542 }
 0x1a8   : > { %1397 = vadd.xlane.f32.xlu0 %v1336_v28  ;;  %1363 = vadd.xlane.f32.xlu1 %v1319_v13 }
 0x1aa   : > { %v4088_v1 = vpop.permute.xlu1 %1546 }
 0x1ab   : > { %v1477_v24 = vpop.permute.xlu0 %1476 }
 0x1ac   : > { %1401 = vadd.xlane.f32.xlu0 %v1338_v59  ;;  %1367 = vadd.xlane.f32.xlu1 %v1321_v4 }
 0x1ae   : > { %v1481_v29 = vpop.permute.xlu1 %1480 }
 0x1af   : > { %v4090_v41 = vpop.permute.xlu0 %1553 }
 0x1b0   : > { %1377 = vadd.xlane.f32.xlu1 %v1326_v49 }
 0x1b2   : > { %v4092_v39 = vpop.permute.xlu1 %1557 }
 0x1b3   : > { %v1488_v42 = vpop.permute.xlu0 %1487 }
 0x1b4   : > { %1375 = vadd.xlane.f32.xlu1 %v1325_v35 }
 0x1b6   : > { %v1492_v36 = vpop.permute.xlu1 %1491 }
 0x1b7   : > { %v4094_v43 = vpop.permute.xlu0 %1564 }
 0x1b8   : > { %1379 = vadd.xlane.f32.xlu1 %v1327_v30 }
 0x1ba   : > { %v4096_v51 = vpop.permute.xlu1 %1568 }
 0x1bc   : > { %1383 = vadd.xlane.f32.xlu1 %v1329_v53 }
 0x1be   : > { %v1503_v46 = vpop.permute.xlu1 %1502 }
 0x1c0   : > { %1387 = vadd.xlane.f32.xlu1 %v1331_v52  ;;  %v1499_v52 = vpop.permute.xlu0 %1498 }
 0x1c4   : > { %1391 = vadd.xlane.f32.xlu1 %v1333_v45  ;;  %v4098_v2 = vpop.permute.xlu0 %1575  ;;  %v4100_v45 = vpop.permute.xlu1 %1579 }
 0x1c8   : > { %1395 = vadd.xlane.f32.xlu1 %v1335_v61  ;;  %v1510_v61 = vpop.permute.xlu0 %1509 }
 0x1cc   : > { %1399 = vadd.xlane.f32.xlu1 %v1337_v54  ;;  %v1514_v54 = vpop.permute.xlu1 %1513  ;;  %v4102_v50 = vpop.permute.xlu0 %1586 }
 0x1d0   : > { %v4104_v37 = vpop.permute.xlu1 %1590  ;;  %v4106_v17 = vpop.permute.xlu0 %1597 }
 0x1d4   : > { %v4108_v31 = vpop.permute.xlu1 %1601 }
 0x20d   : > { %v1354_v21 = vpop.xlane.xlu0 %1353  ;;  %v1342_v23 = vpop.xlane.xlu1 %1341 }
 0x20e   : > { %v4110_v9 = vadd.f32 %v1437_v48, %v1342_v23  ;;  %v4122_v4 = vadd.f32 %v1470_v22, %v1354_v21 }
 0x210   : > { %1705 = vperm.xlu1 %3244, %v4110_v9  }
 0x211   : > { %v1358_v6 = vpop.xlane.xlu0 %1357  ;;  %v1346_v38 = vpop.xlane.xlu1 %1345 }
 0x212   : > { %v4113_v11 = vadd.f32 %v1448_v63, %v1346_v38  ;;  %v4129_v35 = vadd.f32 %v1481_v29, %v1358_v6 }
 0x214   : > { %1711 = vperm.xlu1 %3244, %v4113_v11  }
 0x215   : > { %v1362_v58 = vpop.xlane.xlu0 %1361  ;;  %v1350_v34 = vpop.xlane.xlu1 %1349 }
 0x216   : > { %v4116_v12 = vadd.f32 %v1459_v47, %v1350_v34  ;;  %v4136_v44 = vadd.f32 %v1492_v36, %v1362_v58 }
 0x218   : > { %1717 = vperm.xlu1 %3244, %v4116_v12  }
 0x219   : > { %v1366_v40 = vpop.xlane.xlu0 %1365  ;;  %v1374_v28 = vpop.xlane.xlu1 %1373 }
 0x21a   : > { %v4119_v13 = vadd.f32 %v1525_v18, %v1374_v28  ;;  %v4143_v53 = vadd.f32 %v1503_v46, %v1366_v40 }
 0x21c   : > { %1753 = vperm.xlu1 %3244, %v4119_v13  }
 0x21d   : > { %v1370_v5 = vpop.xlane.xlu0 %1369  ;;  %v1340_v59 = vpop.xlane.xlu1 %1339 }
 0x21e   : > { %v4125_v25 = vadd.f32 %v4064_v27, %v1340_v59  ;;  %v4150_v18 = vadd.f32 %v1514_v54, %v1370_v5 }
 0x220   : > { %1723 = vperm.xlu1 %3244, %v4122_v4   ;;  %1702 = vperm.xlu0 %3243, %v4125_v25  }
 0x221   : > { %v1344_v49 = vpop.xlane.xlu0 %1343  ;;  %v1348_v62 = vpop.xlane.xlu1 %1347 }
 0x222   : > { %v4132_v48 = vadd.f32 %v4071_v20, %v1344_v49  ;;  %v4139_v27 = vadd.f32 %v4078_v14, %v1348_v62 }
 0x224   : > { %1729 = vperm.xlu1 %3244, %v4129_v35   ;;  %1708 = vperm.xlu0 %3243, %v4132_v48  }
 0x225   : > { %v1372_v63 = vpop.xlane.xlu1 %1371 }
 0x226   : > { %v4146_v20 = vadd.f32 %v4080_v16, %v1372_v63  ;;  %v1382_v16 = vpop.xlane.xlu0 %1381 }
 0x227   : > { %v4173_v58 = vadd.f32 %v4088_v1, %v1382_v16 }
 0x228   : > { %1735 = vperm.xlu1 %3244, %v4136_v44   ;;  %1714 = vperm.xlu0 %3243, %v4139_v27  }
 0x229   : > { %v1352_v30 = vpop.xlane.xlu1 %1351 }
 0x22a   : > { %v4152_v22 = vadd.f32 %v1466_v26, %v1352_v30  ;;  %v1386_v26 = vpop.xlane.xlu0 %1385  ;;  %v3481_v30 = vmov -inf  }
 0x22b   : > { %406 = vst.msk [vmem:[#allocation2] sm:$0xff] %vm405_vm0, %v3481_v30  ;;  %407 = vst.msk [vmem:[#allocation2 + $0x8] sm:$0xff] %vm405_vm0, %v3481_v30 }
 0x22c   : > { %1741 = vperm.xlu1 %3244, %v4143_v53   ;;  %1750 = vperm.xlu0 %3243, %v4146_v20  }
 0x22d   : > { %v1356_v47 = vpop.xlane.xlu1 %1355 }
 0x22e   : > { %v4156_v29 = vadd.f32 %v1477_v24, %v1356_v47 }
 0x230   : > { %1747 = vperm.xlu1 %3244, %v4150_v18   ;;  %1720 = vperm.xlu0 %3243, %v4152_v22  }
 0x231   : > { %v1360_v14 = vpop.xlane.xlu1 %1359 }
 0x232   : > { %v4159_v46 = vadd.f32 %v1488_v42, %v1360_v14  ;;  %v1390_v42 = vpop.xlane.xlu0 %1389 }
 0x234   : > { %1726 = vperm.xlu0 %3243, %v4156_v29  }
 0x235   : > { %v1364_v36 = vpop.xlane.xlu1 %1363 }
 0x236   : > { %v4162_v54 = vadd.f32 %v1499_v52, %v1364_v36  ;;  %v1394_v40 = vpop.xlane.xlu0 %1393 }
 0x238   : > { %1732 = vperm.xlu0 %3243, %v4159_v46  }
 0x239   : > { %v1368_v21 = vpop.xlane.xlu1 %1367 }
 0x23a   : > { %v4165_v6 = vadd.f32 %v1510_v61, %v1368_v21 }
 0x23c   : > { %1738 = vperm.xlu0 %3243, %v4162_v54  }
 0x23d   : > { %v1378_v23 = vpop.xlane.xlu1 %1377 }
 0x23e   : > { %v4168_v24 = vadd.f32 %v4084_v60, %v1378_v23  ;;  %v4181_v60 = vadd.f32 %v4092_v39, %v1386_v26  ;;  %v1398_v39 = vpop.xlane.xlu0 %1397 }
 0x240   : > { %1744 = vperm.xlu0 %3243, %v4165_v6   ;;  %1759 = vperm.xlu1 %3244, %v4168_v24  }
 0x241   : > { %v1376_v38 = vpop.xlane.xlu1 %1375 }
 0x242   : > { %v4176_v52 = vadd.f32 %v4082_v57, %v1376_v38  ;;  %v4189_v57 = vadd.f32 %v4096_v51, %v1390_v42  ;;  %v1402_v62 = vpop.xlane.xlu0 %1401 }
 0x244   : > { %1765 = vperm.xlu1 %3244, %v4173_v58   ;;  %1756 = vperm.xlu0 %3243, %v4176_v52  }
 0x245   : > { %v1380_v61 = vpop.xlane.xlu1 %1379 }
 0x246   : > { %v4184_v34 = vadd.f32 %v4086_v32, %v1380_v61  ;;  %v4197_v32 = vadd.f32 %v4100_v45, %v1394_v40 }
 0x248   : > { %1771 = vperm.xlu1 %3244, %v4181_v60   ;;  %1762 = vperm.xlu0 %3243, %v4184_v34  }
 0x249   : > { %v1384_v1 = vpop.xlane.xlu1 %1383 }
 0x24a   : > { %v4192_v28 = vadd.f32 %v4090_v41, %v1384_v1  ;;  %v4205_v41 = vadd.f32 %v4104_v37, %v1398_v39 }
 0x24c   : > { %1777 = vperm.xlu1 %3244, %v4189_v57   ;;  %1768 = vperm.xlu0 %3243, %v4192_v28   ;;  %4557 = vst [vmem:[#allocation15_spill] sm:$0xff] %v4205_v41 }
 0x24d   : > { %v1388_v5 = vpop.xlane.xlu1 %1387 }
 0x24e   : > { %v4200_v59 = vadd.f32 %v4094_v43, %v1388_v5  ;;  %v4213_v43 = vadd.f32 %v4108_v31, %v1402_v62 }
 0x250   : > { %1783 = vperm.xlu1 %3244, %v4197_v32   ;;  %1774 = vperm.xlu0 %3243, %v4200_v59   ;;  %4558 = vst [vmem:[#allocation16_spill] sm:$0xff] %v4213_v43 }
 0x251   : > { %v1392_v51 = vpop.xlane.xlu1 %1391 }
 0x252   : > { %v4208_v49 = vadd.f32 %v4098_v2, %v1392_v51 }
 0x254   : > { %1789 = vperm.xlu1 %3244, %v4205_v41   ;;  %1780 = vperm.xlu0 %3243, %v4208_v49  }
 0x255   : > { %v1396_v45 = vpop.xlane.xlu1 %1395 }
 0x256   : > { %v4216_v63 = vadd.f32 %v4102_v50, %v1396_v45 }
 0x258   : > { %1795 = vperm.xlu1 %3244, %v4213_v43   ;;  %1786 = vperm.xlu0 %3243, %v4216_v63  }
 0x259   : > { %v1400_v37 = vpop.xlane.xlu1 %1399 }
 0x25a   : > { %v4221_v2 = vadd.f32 %v4106_v17, %v1400_v37 }
 0x25c   : > { %4559 = vst [vmem:[#allocation17_spill] sm:$0xff] %v4221_v2  ;;  %1792 = vperm.xlu0 %3243, %v4221_v2  }
 0x28f   : > { %v1706_v31 = vpop.permute.xlu1 %1705 }
 0x290   : > { %v1807_v43 = vrot.slane %v1706_v31, %v3714_v10 }
 0x293   : > { %v1712_v47 = vpop.permute.xlu1 %1711 }
 0x294   : > { %v1817_v51 = vrot.slane %v1712_v47, %v3714_v10 }
 0x297   : > { %v1718_v50 = vpop.permute.xlu1 %1717 }
 0x298   : > { %v1826_v37 = vrot.slane %v1718_v50, %v3714_v10 }
 0x29b   : > { %v4226_v14 = vpop.permute.xlu1 %1753 }
 0x29f   : > { %v1703_v16 = vpop.permute.xlu0 %1702  ;;  %v1724_v36 = vpop.permute.xlu1 %1723 }
 0x2a0   : > { %v1802_v62 = vrot.slane %v1703_v16, %v3701_v7  ;;  %v1835_v2 = vrot.slane %v1724_v36, %v3714_v10 }
 0x2a2   : > { %v1809_v41 = vsel %vm1808_vm1, %v1807_v43, %v1802_v62 }
 0x2a3   : > { %v1709_v21 = vpop.permute.xlu0 %1708  ;;  %v1730_v23 = vpop.permute.xlu1 %1729 }
 0x2a4   : > { %v1813_v1 = vrot.slane %v1709_v21, %v3701_v7  ;;  %v1844_v47 = vrot.slane %v1730_v23, %v3714_v10 }
 0x2a6   : > { %v1818_v21 = vsel %vm1808_vm1, %v1817_v51, %v1813_v1 }
 0x2a7   : > { %v1715_v26 = vpop.permute.xlu0 %1714  ;;  %v1736_v42 = vpop.permute.xlu1 %1735  ;;  %v1946_v1 = vsel %vm1945_vm2, %v1818_v21, %v1809_v41 }
 0x2a8   : > { %v1822_v39 = vrot.slane %v1715_v26, %v3701_v7 }
 0x2aa   : > { %v1827_v16 = vsel %vm1808_vm1, %v1826_v37, %v1822_v39 }
 0x2ab   : > { %v4228_v17 = vpop.permute.xlu0 %1750  ;;  %v1742_v40 = vpop.permute.xlu1 %1741  ;;  %v1948_v39 = vsel %vm1947_vm3, %v1827_v16, %v1946_v1 }
 0x2af   : > { %v1721_v38 = vpop.permute.xlu0 %1720 }
 0x2b0   : > { %v1831_v45 = vrot.slane %v1721_v38, %v3701_v7  ;;  %v1748_v38 = vpop.permute.xlu1 %1747 }
 0x2b2   : > { %v1836_v31 = vsel %vm1808_vm1, %v1835_v2, %v1831_v45  ;;  %v1871_v45 = vrot.slane %v1748_v38, %v3714_v10 }
 0x2b3   : > { %v1727_v61 = vpop.permute.xlu0 %1726  ;;  %v1950_v43 = vsel %vm1949_vm4, %v1836_v31, %v1948_v39 }
 0x2b4   : > { %v1840_v30 = vrot.slane %v1727_v61, %v3701_v7  ;;  %v1853_v61 = vrot.slane %v1736_v42, %v3714_v10 }
 0x2b6   : > { %v1845_v23 = vsel %vm1808_vm1, %v1844_v47, %v1840_v30 }
 0x2b7   : > { %v1733_v5 = vpop.permute.xlu0 %1732  ;;  %v1952_v41 = vsel %vm1951_vm5, %v1845_v23, %v1950_v43 }
 0x2b8   : > { %v1849_v26 = vrot.slane %v1733_v5, %v3701_v7  ;;  %v1862_v5 = vrot.slane %v1742_v40, %v3714_v10 }
 0x2ba   : > { %v1854_v51 = vsel %vm1808_vm1, %v1853_v61, %v1849_v26 }
 0x2bb   : > { %v1739_v50 = vpop.permute.xlu0 %1738  ;;  %v1954_v37 = vsel %vm1953_vm6, %v1854_v51, %v1952_v41 }
 0x2bc   : > { %v1858_v36 = vrot.slane %v1739_v50, %v3701_v7 }
 0x2be   : > { %v1863_v42 = vsel %vm1808_vm1, %v1862_v5, %v1858_v36 }
 0x2bf   : > { %v1745_v62 = vpop.permute.xlu0 %1744  ;;  %v1760_v2 = vpop.permute.xlu1 %1759  ;;  %v1956_v21 = vsel %vm1955_vm7, %v1863_v42, %v1954_v37  ;;  %v1876_v42 = vrot.slane %v4228_v17, %v3701_v7  ;;  %v1880_v37 = vrot.slane %v4226_v14, %v3714_v10 }
 0x2c0   : > { %v1867_v40 = vrot.slane %v1745_v62, %v3701_v7  ;;  %v1889_v62 = vrot.slane %v1760_v2, %v3714_v10 }
 0x2c2   : > { %v1872_v30 = vsel %vm1808_vm1, %v1871_v45, %v1867_v40 }
 0x2c3   : > { %v1757_v26 = vpop.permute.xlu0 %1756  ;;  %v1766_v47 = vpop.permute.xlu1 %1765  ;;  %v1958_v16 = vsel %vm1957_vm8, %v1872_v30, %v1956_v21 }
 0x2c4   : > { %v1969_v50 = vsel %vm1968_vm9, %v1958_v16, -inf  ;;  %v1885_v23 = vrot.slane %v1757_v26, %v3701_v7  ;;  %v1898_v41 = vrot.slane %v1766_v47, %v3714_v10 }
 0x2c5   : > { %1970 = vmax.xlane.f32.xlu0 %v1969_v50  ;;  %v1881_v50 = vsel %vm1808_vm1, %v1880_v37, %v1876_v42 }
 0x2c6   : > { %v1890_v30 = vsel %vm1808_vm1, %v1889_v62, %v1885_v23 }
 0x2c7   : > { %v1763_v38 = vpop.permute.xlu0 %1762  ;;  %v1772_v61 = vpop.permute.xlu1 %1771  ;;  %v1959_v14 = vsel %vm1945_vm2, %v1890_v30, %v1881_v50 }
 0x2c8   : > { %v1894_v39 = vrot.slane %v1763_v38, %v3701_v7  ;;  %v1907_v21 = vrot.slane %v1772_v61, %v3714_v10 }
 0x2ca   : > { %v1899_v16 = vsel %vm1808_vm1, %v1898_v41, %v1894_v39 }
 0x2cb   : > { %v1769_v31 = vpop.permute.xlu0 %1768  ;;  %v1778_v36 = vpop.permute.xlu1 %1777  ;;  %v1960_v39 = vsel %vm1947_vm3, %v1899_v16, %v1959_v14  ;;  %v4298_v16 = vld [vmem:[#allocation2] sm:$0xff] }
 0x2cc   : > { %v1903_v45 = vrot.slane %v1769_v31, %v3701_v7  ;;  %v1916_v17 = vrot.slane %v1778_v36, %v3714_v10 }
 0x2ce   : > { %v1908_v47 = vsel %vm1808_vm1, %v1907_v21, %v1903_v45 }
 0x2cf   : > { %v1775_v1 = vpop.permute.xlu0 %1774  ;;  %v1784_v5 = vpop.permute.xlu1 %1783 }
 0x2d0   : > { %v1912_v40 = vrot.slane %v1775_v1, %v3701_v7  ;;  %v1925_v38 = vrot.slane %v1784_v5, %v3714_v10 }
 0x2d2   : > { %v1917_v1 = vsel %vm1808_vm1, %v1916_v17, %v1912_v40 }
 0x2d3   : > { %v1781_v51 = vpop.permute.xlu0 %1780  ;;  %v1790_v43 = vpop.permute.xlu1 %1789 }
 0x2d4   : > { %v1921_v26 = vrot.slane %v1781_v51, %v3701_v7  ;;  %v1934_v61 = vrot.slane %v1790_v43, %v3714_v10  ;;  %v1961_v51 = vsel %vm1949_vm4, %v1908_v47, %v1960_v39  ;;  %v4308_v47 = vld [vmem:[#allocation2 + $0x8] sm:$0xff] }
 0x2d5   : > { %v1962_v5 = vsel %vm1951_vm5, %v1917_v1, %v1961_v51 }
 0x2d6   : > { %v1926_v36 = vsel %vm1808_vm1, %v1925_v38, %v1921_v26  ;;  %v3482_v26 = vmov 0.0  }
 0x2d7   : > { %v1787_v2 = vpop.permute.xlu0 %1786  ;;  %v1796_v23 = vpop.permute.xlu1 %1795  ;;  %v1963_v40 = vsel %vm1953_vm6, %v1926_v36, %v1962_v5  ;;  %408 = vst.msk [vmem:[#allocation3] sm:$0xff] %vm405_vm0, %v3482_v26  ;;  %409 = vst.msk [vmem:[#allocation3 + $0x8] sm:$0xff] %vm405_vm0, %v3482_v26 }
 0x2d8   : > { %v1930_v31 = vrot.slane %v1787_v2, %v3701_v7  ;;  %v1943_v45 = vrot.slane %v1796_v23, %v3714_v10 }
 0x2da   : > { %v1935_v42 = vsel %vm1808_vm1, %v1934_v61, %v1930_v31 }
 0x2db   : > { %v1793_v62 = vpop.permute.xlu0 %1792  ;;  %v1964_v37 = vsel %vm1955_vm7, %v1935_v42, %v1963_v40 }
 0x2dc   : > { %v1939_v41 = vrot.slane %v1793_v62, %v3701_v7 }
 0x2de   : > { %v1944_v43 = vsel %vm1808_vm1, %v1943_v45, %v1939_v41 }
 0x2df   : > { %v1965_v30 = vsel %vm1957_vm8, %v1944_v43, %v1964_v37 }
 0x2e0   : > { %v1972_v21 = vsel %vm1968_vm9, %v1965_v30, -inf }
 0x2e1   : > { %1973 = vmax.xlane.f32.xlu1 %v1972_v21 }
 0x352   : > { %v1971_v17 = vpop.xlane.xlu0 %1970 }
 0x353   : > { %v4301_v2 = vmax.f32 %v4298_v16, %v1971_v17 }
 0x355   : > { %v1977_v50 = vsub.f32 %v4298_v16, %v4301_v2  ;;  %2567 = vst.msk [vmem:[#allocation2] sm:$0xff] %vm405_vm0, %v4301_v2  ;;  %1985 = vperm.xlu0 %3243, %v4301_v2   ;;  %v2168_v2 = vld [vmem:[#allocation3 + $0x8] sm:$0xff] }
 0x36e   : > { %v1974_v38 = vpop.xlane.xlu1 %1973 }
 0x36f   : > { %v4311_v31 = vmax.f32 %v4308_v47, %v1974_v38 }
 0x371   : > { %v1978_v14 = vsub.f32 %v4308_v47, %v4311_v31  ;;  %2568 = vst.msk [vmem:[#allocation2 + $0x8] sm:$0xff] %vm405_vm0, %v4311_v31  ;;  %1989 = vperm.xlu1 %3244, %v4311_v31  }
 0x3d4   : > { %v1986_v1 = vpop.permute.xlu0 %1985 }
 0x3d5   : > { %v1994_v61 = vrot.slane %v1986_v1, %v3736_v33  ;;  %v1998_v23 = vrot.slane %v1986_v1, %v3827_v56  ;;  %v2002_v51 = vrot.slane %v1986_v1, %v3824_v55  ;;  %v2006_v41 = vrot.slane %v1986_v1, %v3835_v0 }
 0x3d6   : > { %v2014_v26 = vrot.slane %v1986_v1, %v3845_v8 }
 0x3d7   : > { %v2071_v39 = vsub.f32 %v4125_v25, %v1994_v61  ;;  %v2072_v36 = vsub.f32 %v4110_v9, %v1994_v61  ;;  %v2073_v42 = vsub.f32 %v4132_v48, %v1998_v23  ;;  %v2074_v62 = vsub.f32 %v4113_v11, %v1998_v23 }
 0x3d8   : > { %v2075_v40 = vsub.f32 %v4139_v27, %v2002_v51  ;;  %v2076_v37 = vsub.f32 %v4116_v12, %v2002_v51  ;;  %v2010_v9 = vrot.slane %v1986_v1, %v3840_v3  ;;  %v2077_v30 = vsub.f32 %v4152_v22, %v2006_v41 }
 0x3d9   : > { %v2103_v5 = vmul.f32 1.442695, %v2071_v39  ;;  %v2105_v45 = vmul.f32 1.442695, %v2072_v36  ;;  %v2107_v43 = vmul.f32 1.442695, %v2073_v42  ;;  %v2078_v11 = vsub.f32 %v4122_v4, %v2006_v41 }
 0x3da   : > { %v2109_v25 = vmul.f32 1.442695, %v2074_v62  ;;  %v2111_v48 = vmul.f32 1.442695, %v2075_v40  ;;  %v2113_v21 = vmul.f32 1.442695, %v2076_v37  ;;  %v2079_v27 = vsub.f32 %v4156_v29, %v2010_v9 }
 0x3db   : > { %3247 = vpow2.f32 %v2103_v5  ;;  %v2115_v17 = vmul.f32 1.442695, %v2077_v30  ;;  %v2080_v12 = vsub.f32 %v4129_v35, %v2010_v9  ;;  %v2117_v38 = vmul.f32 1.442695, %v2078_v11 }
 0x3dc   : > { %3249 = vpow2.f32 %v2105_v45  ;;  %v2018_v22 = vrot.slane %v1986_v1, %v3850_v15  ;;  %v2081_v39 = vsub.f32 %v4159_v46, %v2014_v26  ;;  %v2119_v4 = vmul.f32 1.442695, %v2079_v27 }
 0x3dd   : > { %3251 = vpow2.f32 %v2107_v43  ;;  %v2082_v36 = vsub.f32 %v4136_v44, %v2014_v26  ;;  %v2121_v29 = vmul.f32 1.442695, %v2080_v12  ;;  %v2022_v35 = vrot.slane %v1986_v1, %v3855_v19 }
 0x3de   : > { %3253 = vpow2.f32 %v2109_v25  ;;  %v2083_v62 = vsub.f32 %v4162_v54, %v2018_v22  ;;  %v2123_v5 = vmul.f32 1.442695, %v2081_v39  ;;  %v2084_v45 = vsub.f32 %v4143_v53, %v2018_v22 }
 0x3df   : > { %3255 = vpow2.f32 %v2111_v48  ;;  %v2125_v46 = vmul.f32 1.442695, %v2082_v36  ;;  %v2085_v43 = vsub.f32 %v4165_v6, %v2022_v35  ;;  %v2086_v1 = vsub.f32 %v4150_v18, %v2022_v35 }
 0x3e0   : > { %3257 = vpow2.f32 %v2113_v21  ;;  %v2127_v37 = vmul.f32 1.442695, %v2083_v62  ;;  %v2129_v25 = vmul.f32 1.442695, %v2084_v45 }
 0x3e1   : > { %3259 = vpow2.f32 %v2115_v17  ;;  %v2131_v30 = vmul.f32 1.442695, %v2085_v43  ;;  %v2133_v11 = vmul.f32 1.442695, %v2086_v1 }
 0x3e2   : > { %3261 = vpow2.f32 %v2117_v38 }
 0x3e3   : > { %3263 = vpow2.f32 %v2119_v4 }
 0x3e4   : > { %3265 = vpow2.f32 %v2121_v29 }
 0x3e5   : > { %v3248_v61 = vpop.eup %3247  ;;  %3267 = vpow2.f32 %v2123_v5 }
 0x3e6   : > { %v3250_v23 = vpop.eup %3249  ;;  %2204 = vperm.xlu0 %3243, %v3248_v61   ;;  %3269 = vpow2.f32 %v2125_v46 }
 0x3e7   : > { %2207 = vperm.xlu1 %3244, %v3250_v23   ;;  %v3252_v51 = vpop.eup %3251  ;;  %3271 = vpow2.f32 %v2127_v37 }
 0x3e8   : > { %v3254_v42 = vpop.eup %3253  ;;  %3273 = vpow2.f32 %v2129_v25 }
 0x3e9   : > { %v3256_v41 = vpop.eup %3255  ;;  %3275 = vpow2.f32 %v2131_v30  ;;  %v4562_v30 = vld [vmem:[#allocation16_spill] sm:$0xff] }
 0x3ea   : > { %2210 = vperm.xlu0 %3243, %v3252_v51   ;;  %v3258_v40 = vpop.eup %3257  ;;  %3277 = vpow2.f32 %v2133_v11 }
 0x3eb   : > { %2213 = vperm.xlu1 %3244, %v3254_v42   ;;  %v3260_v53 = vpop.eup %3259 }
 0x3ec   : > { %v3262_v9 = vpop.eup %3261 }
 0x3ee   : > { %2216 = vperm.xlu0 %3243, %v3256_v41  }
 0x3ef   : > { %2219 = vperm.xlu1 %3244, %v3258_v40  }
 0x3f0   : > { %v4340_v44 = vpop.permute.xlu1 %1989 }
 0x3f1   : > { %v2026_v54 = vrot.slane %v4340_v44, %v3736_v33  ;;  %v2030_v48 = vrot.slane %v4340_v44, %v3827_v56  ;;  %v3264_v33 = vpop.eup %3263  ;;  %v2034_v18 = vrot.slane %v4340_v44, %v3824_v55 }
 0x3f2   : > { %2222 = vperm.xlu0 %3243, %v3260_v53   ;;  %v3266_v26 = vpop.eup %3265 }
 0x3f3   : > { %v2087_v6 = vsub.f32 %v4146_v20, %v2026_v54  ;;  %2225 = vperm.xlu1 %3244, %v3262_v9   ;;  %v2088_v21 = vsub.f32 %v4119_v13, %v2026_v54  ;;  %v2089_v27 = vsub.f32 %v4176_v52, %v2030_v48  ;;  %v2090_v56 = vsub.f32 %v4168_v24, %v2030_v48  ;;  %v3268_v12 = vpop.eup %3267 }
 0x3f4   : > { %v3270_v38 = vpop.eup %3269  ;;  %v2038_v13 = vrot.slane %v4340_v44, %v3835_v0  ;;  %v2091_v61 = vsub.f32 %v4184_v34, %v2034_v18  ;;  %v2092_v55 = vsub.f32 %v4173_v58, %v2034_v18  ;;  %v2042_v24 = vrot.slane %v4340_v44, %v3840_v3 }
 0x3f5   : > { %v2135_v17 = vmul.f32 1.442695, %v2087_v6  ;;  %v2137_v20 = vmul.f32 1.442695, %v2088_v21  ;;  %v2139_v23 = vmul.f32 1.442695, %v2089_v27  ;;  %v3272_v22 = vpop.eup %3271  ;;  %v2046_v58 = vrot.slane %v4340_v44, %v3845_v8 }
 0x3f6   : > { %2228 = vperm.xlu0 %3243, %v3264_v33   ;;  %v2141_v52 = vmul.f32 1.442695, %v2090_v56  ;;  %v3274_v39 = vpop.eup %3273  ;;  %v2093_v4 = vsub.f32 %v4192_v28, %v2038_v13  ;;  %v2143_v36 = vmul.f32 1.442695, %v2091_v61  ;;  %v2094_v0 = vsub.f32 %v4181_v60, %v2038_v13  ;;  %v2573_v61 = vld [vmem:[#allocation2 + $0x8] sm:$0xff] }
 0x3f7   : > { %2231 = vperm.xlu1 %3244, %v3266_v26   ;;  %3279 = vpow2.f32 %v2135_v17  ;;  %v2145_v34 = vmul.f32 1.442695, %v2092_v55  ;;  %v3276_v29 = vpop.eup %3275  ;;  %v2095_v42 = vsub.f32 %v4200_v59, %v2042_v24  ;;  %v2096_v3 = vsub.f32 %v4189_v57, %v2042_v24 }
 0x3f8   : > { %3281 = vpow2.f32 %v2137_v20  ;;  %v3278_v51 = vpop.eup %3277  ;;  %v2147_v35 = vmul.f32 1.442695, %v2093_v4  ;;  %v2149_v28 = vmul.f32 1.442695, %v2094_v0  ;;  %v2050_v60 = vrot.slane %v4340_v44, %v3850_v15  ;;  %v4560_v15 = vld [vmem:[#allocation15_spill] sm:$0xff] }
 0x3f9   : > { %3283 = vpow2.f32 %v2139_v23  ;;  %v2097_v45 = vsub.f32 %v4208_v49, %v2046_v58  ;;  %v2151_v46 = vmul.f32 1.442695, %v2095_v42  ;;  %v2098_v8 = vsub.f32 %v4197_v32, %v2046_v58  ;;  %v4561_v32 = vld [vmem:[#allocation17_spill] sm:$0xff]  ;;  %v2572_v23 = vld [vmem:[#allocation2] sm:$0xff] }
 0x3fa   : > { %2234 = vperm.xlu0 %3243, %v3268_v12   ;;  %3285 = vpow2.f32 %v2141_v52  ;;  %v2153_v59 = vmul.f32 1.442695, %v2096_v3  ;;  %v2054_v57 = vrot.slane %v4340_v44, %v3855_v19  ;;  %v2099_v43 = vsub.f32 %v4216_v63, %v2050_v60  ;;  %v3325_v12 = vld [vmem:[%s3683_s27] sm:$0xff] }
 0x3fb   : > { %2237 = vperm.xlu1 %3244, %v3270_v38   ;;  %3287 = vpow2.f32 %v2143_v36  ;;  %v2155_v37 = vmul.f32 1.442695, %v2097_v45  ;;  %v2100_v49 = vsub.f32 %v4560_v15, %v2050_v60  ;;  %v2157_v54 = vmul.f32 1.442695, %v2098_v8  ;;  %v3326_v38 = vld [vmem:[%s3683_s27 + $0x8] sm:$0xff]  ;;  %s3161_s27 = smul.u32 768, %s3465_s24 }
 0x3fc   : > { %3289 = vpow2.f32 %v2145_v34  ;;  %v2101_v53 = vsub.f32 %v4561_v32, %v2054_v57  ;;  %v2159_v9 = vmul.f32 1.442695, %v2099_v43  ;;  %v2102_v48 = vsub.f32 %v4562_v30, %v2054_v57  ;;  %s3483_s24 = smov [#allocation11]  }
 0x3fd   : > { %3291 = vpow2.f32 %v2147_v35  ;;  %v2161_v19 = vmul.f32 1.442695, %v2100_v49  ;;  %v3156_v13 = vpack.c.bf16 %v3326_v38, %v3325_v12  ;;  %v2593_v55 = vsel %vm405_vm0, %v2573_v61, -inf  ;;  %s4474_s16 = scalar_lea.hbm %s4532_s6, %s3161_s27  ;;  %s3391_s11 = sshll.u32 %s3483_s24, 4  ;;  %s3392_s11 = int_to_ptr.vmem [resolvable:$false] %s3391_s11 }
 0x3fe   : > { %2240 = vperm.xlu0 %3243, %v3272_v22   ;;  %3293 = vpow2.f32 %v2149_v28  ;;  %v2163_v6 = vmul.f32 1.442695, %v2101_v53  ;;  %v2165_v11 = vmul.f32 1.442695, %v2102_v48  ;;  %v2592_v52 = vsel %vm405_vm0, %v2572_v23, -inf  ;;  %s3393_s19 = scalar_lea.vmem %s3392_s11, 1536  ;;  %p3394_p11 = scmp.lt.s32.totalorder %s4476_s28, %s3392_s11 }
 0x3ff   : > { %2243 = vperm.xlu1 %3244, %v3274_v39   ;;  %3295 = vpow2.f32 %v2151_v46  ;;  %3157 = vmatprep.subr.bf16.mxu1 %v3156_v13  ;;  %v2594_v22 = vmax.f32 %v2592_v52, %v2593_v55  ;;  %p3395_p0 = scmp.lt.s32.totalorder %s3393_s19, %s3387_s14 }
 0x400   : > { %3297 = vpow2.f32 %v2153_v59  ;;  %3159 = vmatpush3.bf16.msra.mxu1 %v3156_v13 }
 0x401   : > { %v3280_v62 = vpop.eup %3279  ;;  %3299 = vpow2.f32 %v2155_v37  ;;  %v2595_v39 = vrot.slane %v2594_v22, 4  ;;  %p3396_p5 = por %p3395_p0, %p3394_p11 }
 0x402   : > { %2246 = vperm.xlu0 %3243, %v3276_v29   ;;  %v3282_v5 = vpop.eup %3281  ;;  %3301 = vpow2.f32 %v2157_v54 }
 0x403   : > { %2249 = vperm.xlu1 %3244, %v3278_v51   ;;  %v3284_v41 = vpop.eup %3283  ;;  %3303 = vpow2.f32 %v2159_v9  ;;  %v2596_v24 = vmax.f32 %v2594_v22, %v2595_v39  ;;  %p3397_p9 = pnand %p3396_p5, %p3390_p12 }
 0x404   : > { %v3286_v40 = vpop.eup %3285  ;;  %3305 = vpow2.f32 %v2161_v19 }
 0x405   : > { %v3288_v1 = vpop.eup %3287  ;;  %3307 = vpow2.f32 %v2163_v6  ;;  %v2597_v4 = vrot.slane %v2596_v24, 2 }
 0x406   : > { %2252 = vperm.xlu0 %3243, %v3280_v62   ;;  %v3290_v25 = vpop.eup %3289  ;;  %3309 = vpow2.f32 %v2165_v11 }
 0x407   : > { %2255 = vperm.xlu1 %3244, %v3282_v5   ;;  %v3292_v63 = vpop.eup %3291  ;;  %v2598_v36 = vmax.f32 %v2596_v24, %v2597_v4 }
 0x408   : > { %v3294_v44 = vpop.eup %3293 }
 0x409   : > { %v3296_v21 = vpop.eup %3295  ;;  %v2599_v0 = vrot.slane %v2598_v36, 1 }
 0x40a   : > { %2258 = vperm.xlu0 %3243, %v3284_v41   ;;  %v3298_v33 = vpop.eup %3297 }
 0x40b   : > { %2261 = vperm.xlu1 %3244, %v3286_v40   ;;  %v3300_v26 = vpop.eup %3299  ;;  %v2600_v34 = vmax.f32 %v2598_v36, %v2599_v0 }
 0x40c   : > { %v3302_v18 = vpop.eup %3301 }
 0x40d   : > { %v3304_v27 = vpop.eup %3303  ;;  %v2601_v29 = vsub.f32 %v2572_v23, %v2600_v34  ;;  %v2602_v51 = vsub.f32 %v2573_v61, %v2600_v34 }
 0x40e   : > { %2264 = vperm.xlu0 %3243, %v3288_v1   ;;  %v3306_v17 = vpop.eup %3305 }
 0x40f   : > { %2267 = vperm.xlu1 %3244, %v3290_v25   ;;  %v3308_v56 = vpop.eup %3307  ;;  %v2603_v58 = vmul.f32 1.442695, %v2601_v29  ;;  %v2605_v42 = vmul.f32 1.442695, %v2602_v51 }
 0x410   : > { %v3310_v20 = vpop.eup %3309 }
 0x411   : > { %3311 = vpow2.f32 %v2603_v58 }
 0x412   : > { %2270 = vperm.xlu0 %3243, %v3292_v63   ;;  %3313 = vpow2.f32 %v2605_v42 }
 0x413   : > { %2273 = vperm.xlu1 %3244, %v3294_v44  }
 0x416   : > { %2276 = vperm.xlu0 %3243, %v3296_v21  }
 0x417   : > { %2279 = vperm.xlu1 %3244, %v3298_v33  }
 0x41a   : > { %2282 = vperm.xlu0 %3243, %v3300_v26  }
 0x41b   : > { %2285 = vperm.xlu1 %3244, %v3302_v18   ;;  %v4380_v5 = vpop.eup %3311 }
 0x41c   : > { %v4382_v60 = vpop.eup %3313  ;;  %v2607_v8 = vsel %vm405_vm0, %v4380_v5, 0.0 }
 0x41d   : > { %v2608_v59 = vsel %vm405_vm0, %v4382_v60, 0.0 }
 0x41e   : > { %2288 = vperm.xlu0 %3243, %v3304_v27   ;;  %v2609_v57 = vadd.f32 %v2608_v59, %v2607_v8 }
 0x41f   : > { %2291 = vperm.xlu1 %3244, %v3306_v17  }
 0x420   : > { %v2610_v15 = vrot.slane %v2609_v57, 4 }
 0x422   : > { %2294 = vperm.xlu0 %3243, %v3308_v56   ;;  %v2611_v9 = vadd.f32 %v2610_v15, %v2609_v57 }
 0x423   : > { %2297 = vperm.xlu1 %3244, %v3310_v20  }
 0x424   : > { %v2612_v38 = vrot.slane %v2611_v9, 2 }
 0x426   : > { %v2613_v34 = vadd.f32 %v2612_v38, %v2611_v9 }
 0x465   : > { %v2205_v35 = vpop.permute.xlu0 %2204 }
 0x466   : > { %v2208_v3 = vpop.permute.xlu1 %2207  ;;  %v2302_v30 = vrot.slane %v2205_v35, %v3701_v7 }
 0x467   : > { %v2306_v48 = vrot.slane %v2208_v3, %v3714_v10 }
 0x469   : > { %v2211_v28 = vpop.permute.xlu0 %2210  ;;  %v2307_v56 = vsel %vm1808_vm1, %v2306_v48, %v2302_v30 }
 0x46a   : > { %v2214_v62 = vpop.permute.xlu1 %2213  ;;  %v2311_v49 = vrot.slane %v2211_v28, %v3701_v7 }
 0x46b   : > { %v2315_v54 = vrot.slane %v2214_v62, %v3714_v10  ;;  %v2614_v62 = vrot.slane %v2613_v34, 1 }
 0x46d   : > { %v2217_v45 = vpop.permute.xlu0 %2216  ;;  %v2316_v11 = vsel %vm1808_vm1, %v2315_v54, %v2311_v49  ;;  %v2615_v8 = vadd.f32 %v2614_v62, %v2613_v34 }
 0x46e   : > { %v2220_v46 = vpop.permute.xlu1 %2219  ;;  %v2320_v25 = vrot.slane %v2217_v45, %v3701_v7  ;;  %v2443_v13 = vsel %vm1945_vm2, %v2316_v11, %v2307_v56 }
 0x46f   : > { %v2324_v32 = vrot.slane %v2220_v46, %v3714_v10  ;;  %3315 = vrcp.f32 %v2615_v8 }
 0x471   : > { %v2223_v41 = vpop.permute.xlu0 %2222  ;;  %v2325_v18 = vsel %vm1808_vm1, %v2324_v32, %v2320_v25 }
 0x472   : > { %v2226_v40 = vpop.permute.xlu1 %2225  ;;  %v2329_v19 = vrot.slane %v2223_v41, %v3701_v7  ;;  %v2444_v23 = vsel %vm1947_vm3, %v2325_v18, %v2443_v13 }
 0x473   : > { %v2333_v63 = vrot.slane %v2226_v40, %v3714_v10 }
 0x475   : > { %v2229_v43 = vpop.permute.xlu0 %2228  ;;  %v2334_v20 = vsel %vm1808_vm1, %v2333_v63, %v2329_v19 }
 0x476   : > { %v2232_v37 = vpop.permute.xlu1 %2231  ;;  %v2338_v44 = vrot.slane %v2229_v43, %v3701_v7  ;;  %v2445_v22 = vsel %vm1949_vm4, %v2334_v20, %v2444_v23 }
 0x477   : > { %v2342_v6 = vrot.slane %v2232_v37, %v3714_v10 }
 0x479   : > { %v2235_v1 = vpop.permute.xlu0 %2234  ;;  %v2343_v61 = vsel %vm1808_vm1, %v2342_v6, %v2338_v44  ;;  %v3316_v15 = vpop.eup %3315 }
 0x47a   : > { %v2238_v53 = vpop.permute.xlu1 %2237  ;;  %v2347_v21 = vrot.slane %v2235_v1, %v3701_v7  ;;  %v2446_v36 = vsel %vm1951_vm5, %v2343_v61, %v2445_v22  ;;  %v2617_v6 = vmul.f32 %v3316_v15, %v4380_v5 }
 0x47b   : > { %v2351_v33 = vrot.slane %v2238_v53, %v3714_v10 }
 0x47d   : > { %v2241_v26 = vpop.permute.xlu0 %2240  ;;  %v2352_v55 = vsel %vm1808_vm1, %v2351_v33, %v2347_v21 }
 0x47e   : > { %v2356_v27 = vrot.slane %v2241_v26, %v3701_v7  ;;  %v2244_v17 = vpop.permute.xlu1 %2243  ;;  %v2447_v29 = vsel %vm1953_vm6, %v2352_v55, %v2446_v36 }
 0x47f   : > { %v2360_v12 = vrot.slane %v2244_v17, %v3714_v10 }
 0x481   : > { %v2247_v52 = vpop.permute.xlu0 %2246  ;;  %v2361_v39 = vsel %vm1808_vm1, %v2360_v12, %v2356_v27 }
 0x482   : > { %v2365_v24 = vrot.slane %v2247_v52, %v3701_v7  ;;  %v2250_v4 = vpop.permute.xlu1 %2249  ;;  %v2448_v42 = vsel %vm1955_vm7, %v2361_v39, %v2447_v29 }
 0x483   : > { %v2369_v0 = vrot.slane %v2250_v4, %v3714_v10 }
 0x485   : > { %v2370_v51 = vsel %vm1808_vm1, %v2369_v0, %v2365_v24  ;;  %v2253_v58 = vpop.permute.xlu0 %2252 }
 0x486   : > { %v2256_v35 = vpop.permute.xlu1 %2255  ;;  %v2449_v3 = vsel %vm1957_vm8, %v2370_v51, %v2448_v42  ;;  %v2374_v9 = vrot.slane %v2253_v58, %v3701_v7  ;;  %v2167_v42 = vld [vmem:[#allocation3] sm:$0xff] }
 0x487   : > { %3057 = vmatprep.mubr.msk.f32.mxu1 %vm1968_vm9, %v2449_v3  ;;  %v2459_v28 = vsel %vm1968_vm9, %v2449_v3, 0.0  ;;  %v2378_v30 = vrot.slane %v2256_v35, %v3714_v10 }
 0x488   : > { %2460 = vadd.xlane.f32.xlu0 %v2459_v28 }
 0x489   : > { %v2259_v45 = vpop.permute.xlu0 %2258  ;;  %v2379_v56 = vsel %vm1808_vm1, %v2378_v30, %v2374_v9 }
 0x48a   : > { %v2262_v46 = vpop.permute.xlu1 %2261  ;;  %v2383_v49 = vrot.slane %v2259_v45, %v3701_v7 }
 0x48b   : > { %v2387_v54 = vrot.slane %v2262_v46, %v3714_v10 }
 0x48d   : > { %v2265_v59 = vpop.permute.xlu0 %2264  ;;  %v2388_v11 = vsel %vm1808_vm1, %v2387_v54, %v2383_v49 }
 0x48e   : > { %v2268_v41 = vpop.permute.xlu1 %2267  ;;  %v2392_v25 = vrot.slane %v2265_v59, %v3701_v7  ;;  %v2450_v5 = vsel %vm1945_vm2, %v2388_v11, %v2379_v56 }
 0x48f   : > { %v2396_v32 = vrot.slane %v2268_v41, %v3714_v10  ;;  %v3327_v41 = vld [vmem:[%s3720_s17] sm:$0xff] }
 0x491   : > { %v2271_v40 = vpop.permute.xlu0 %2270  ;;  %v2397_v18 = vsel %vm1808_vm1, %v2396_v32, %v2392_v25 }
 0x492   : > { %v2274_v57 = vpop.permute.xlu1 %2273  ;;  %v2401_v48 = vrot.slane %v2271_v40, %v3701_v7  ;;  %v2451_v13 = vsel %vm1947_vm3, %v2397_v18, %v2450_v5 }
 0x493   : > { %v2405_v19 = vrot.slane %v2274_v57, %v3714_v10  ;;  %v3328_v57 = vld [vmem:[%s3720_s17 + $0x18] sm:$0xff] }
 0x495   : > { %v2277_v43 = vpop.permute.xlu0 %2276  ;;  %v2406_v20 = vsel %vm1808_vm1, %v2405_v19, %v2401_v48 }
 0x496   : > { %v2280_v37 = vpop.permute.xlu1 %2279  ;;  %v2410_v63 = vrot.slane %v2277_v43, %v3701_v7  ;;  %v2452_v55 = vsel %vm1949_vm4, %v2406_v20, %v2451_v13 }
 0x497   : > { %v2414_v44 = vrot.slane %v2280_v37, %v3714_v10 }
 0x499   : > { %v2283_v1 = vpop.permute.xlu0 %2282  ;;  %v2415_v38 = vsel %vm1808_vm1, %v2414_v44, %v2410_v63 }
 0x49a   : > { %v2286_v53 = vpop.permute.xlu1 %2285  ;;  %v2419_v21 = vrot.slane %v2283_v1, %v3701_v7  ;;  %v2453_v24 = vsel %vm1951_vm5, %v2415_v38, %v2452_v55 }
 0x49b   : > { %v2423_v33 = vrot.slane %v2286_v53, %v3714_v10 }
 0x49d   : > { %v2289_v26 = vpop.permute.xlu0 %2288  ;;  %v2424_v61 = vsel %vm1808_vm1, %v2423_v33, %v2419_v21 }
 0x49e   : > { %v2428_v27 = vrot.slane %v2289_v26, %v3701_v7  ;;  %v2292_v17 = vpop.permute.xlu1 %2291  ;;  %2621 = vperm.xlu0 %3243, %v2617_v6   ;;  %v2454_v36 = vsel %vm1953_vm6, %v2424_v61, %v2453_v24 }
 0x49f   : > { %v2432_v12 = vrot.slane %v2292_v17, %v3714_v10 }
 0x4a1   : > { %v2295_v23 = vpop.permute.xlu0 %2294  ;;  %v2433_v52 = vsel %vm1808_vm1, %v2432_v12, %v2428_v27 }
 0x4a2   : > { %v2437_v22 = vrot.slane %v2295_v23, %v3701_v7  ;;  %v2298_v39 = vpop.permute.xlu1 %2297  ;;  %v2455_v0 = vsel %vm1955_vm7, %v2433_v52, %v2454_v36  ;;  %v2618_v7 = vmul.f32 %v3316_v15, %v4382_v60  ;;  %v1981_v60 = vmul.f32 1.442695, %v1978_v14 }
 0x4a3   : > { %v2441_v4 = vrot.slane %v2298_v39, %v3714_v10  ;;  %v1979_v10 = vmul.f32 1.442695, %v1977_v50 }
 0x4a5   : > { %v2442_v34 = vsel %vm1808_vm1, %v2441_v4, %v2437_v22  ;;  %3317 = vpow2.f32 %v1979_v10 }
 0x4a6   : > { %v2456_v29 = vsel %vm1957_vm8, %v2442_v34, %v2455_v0  ;;  %3319 = vpow2.f32 %v1981_v60 }
 0x4a7   : > { %3058 = vmatmul.mubr.msk.f32.vlgmr.msra.gmra.mrb[4].mxu1 %vm1968_vm9, %v2456_v29  ;;  %v2462_v51 = vsel %vm1968_vm9, %v2456_v29, 0.0 }
 0x4a8   : > { %2463 = vadd.xlane.f32.xlu1 %v2462_v51 }
 0x4af   : > { %v3318_v58 = vpop.eup %3317 }
 0x4b0   : > { %v2169_v35 = vmul.f32 %v3318_v58, %v2167_v42  ;;  %v3320_v16 = vpop.eup %3319 }
 0x4b1   : > { %v2170_v50 = vmul.f32 %v3320_v16, %v2168_v2 }
 0x4b9   : > { %2626 = vperm.xlu1 %3244, %v2618_v7  }
 0x515   : > { %v2461_v3 = vpop.xlane.xlu0 %2460 }
 0x516   : > { %v2465_v28 = vadd.f32 %v2461_v3, %v2169_v35 }
 0x518   : > { %2468 = vst.msk [vmem:[#allocation3] sm:$0xff] %vm405_vm0, %v2465_v28 }
 0x51d   : > { %v2622_v8 = vpop.permute.xlu0 %2621 }
 0x51e   : > { %v2629_v40 = vmul.f32 %v3327_v41, %v2622_v8 }
 0x51f   : > { %v2576_v62 = vld [vmem:[#allocation3] sm:$0xff] }
 0x520   : > { %2580 = vperm.xlu0 %3243, %v2576_v62  }
 0x524   : > { %2474 = vperm.xlu0 %3243, %v3318_v58  }
 0x535   : > { %v2464_v45 = vpop.xlane.xlu1 %2463 }
 0x536   : > { %v2466_v46 = vadd.f32 %v2464_v45, %v2170_v50 }
 0x538   : > { %2469 = vst.msk [vmem:[#allocation3 + $0x8] sm:$0xff] %vm405_vm0, %v2466_v46 }
 0x539   : > { %v2627_v59 = vpop.permute.xlu1 %2626 }
 0x53a   : > { %v2630_v43 = vmul.f32 %v3328_v57, %v2627_v59 }
 0x53c   : > { %v2631_v37 = vadd.f32 %v2630_v43, %v2629_v40 }
 0x53e   : > { %v2632_v47 = vrot.slane %v2631_v37, 4 }
 0x53f   : > { %v2577_v31 = vld [vmem:[#allocation3 + $0x8] sm:$0xff] }
 0x540   : > { %v2633_v14 = vadd.f32 %v2632_v47, %v2631_v37  ;;  %2585 = vperm.xlu1 %3244, %v2577_v31  }
 0x542   : > { %v2634_v15 = vrot.slane %v2633_v14, 2 }
 0x544   : > { %v2635_v49 = vadd.f32 %v2634_v15, %v2633_v14  ;;  %2479 = vperm.xlu1 %3244, %v3320_v16  }
 0x546   : > { %v2636_v54 = vrot.slane %v2635_v49, 1 }
 0x548   : > { %v2637_v1 = vadd.f32 %v2636_v54, %v2635_v49 }
 0x54a   : > { %v2642_v25 = vmul.f32 %v3327_v41, %v2637_v1  ;;  %v2643_v32 = vmul.f32 %v3328_v57, %v2637_v1 }
 0x54c   : > { %2644 = vst [vmem:[%s3720_s17 + $0x10] sm:$0xff] %v2642_v25  ;;  %2645 = vst [vmem:[%s3720_s17 + $0x28] sm:$0xff] %v2643_v32 }
 0x57a   : > { %v3059_v53 = vpop.f32.mrb[4].mxu1 }
 0x57b   : > { %v2554_v9 = vpop.f32.mrb[5].mxu1 }
 0x59f   : > { %v2581_v30 = vpop.permute.xlu0 %2580 }
 0x5a0   : > { %3321 = vrcp.f32 %v2581_v30 }
 0x5a3   : > { %v2475_v48 = vpop.permute.xlu0 %2474 }
 0x5a4   : > { %v2482_v19 = vmul.f32 0.0, %v2475_v48 }
 0x5a6   : > { %v2563_v63 = vadd.f32 %v2554_v9, %v2482_v19 }
 0x5aa   : > { %v3322_v44 = vpop.eup %3321 }
 0x5ab   : > { %v2589_v6 = vmul.f32 %v3322_v44, %v2563_v63 }
 0x5ad   : > { %2640 = vst [vmem:[%s3720_s17 + $0x8] sm:$0xff] %v2589_v6 }
 0x5bf   : > { %v2586_v11 = vpop.permute.xlu1 %2585 }
 0x5c0   : > { %3323 = vrcp.f32 %v2586_v11 }
 0x5c3   : > { %v2480_v21 = vpop.permute.xlu1 %2479 }
 0x5c4   : > { %v2483_v33 = vmul.f32 0.0, %v2480_v21 }
 0x5c6   : > { %v2564_v26 = vadd.f32 %v3059_v53, %v2483_v33 }
 0x5ca   : > { %v3324_v18 = vpop.eup %3323 }
 0x5cb   : > { %v2591_v27 = vmul.f32 %v3324_v18, %v2564_v26 }
 0x5cd   : > { %2641 = vst [vmem:[%s3720_s17 + $0x20] sm:$0xff] %v2591_v27 }
 0x5ce   : > { %3400 = shalt.err (!%p3397_p9)
}
 0x5cf   : > { %s3401_s17 = scalar_lea.hbm %s4474_s16, 768  ;;  %s3405_s29 = scalar_lea.hbm %s4532_s6, 1536 }
 0x5d0   : > { %p3402_p1 = scmp.ne.s32.totalorder %s4474_s16, %s3401_s17  ;;  %p3406_p7 = scmp.lt.u32.totalorder %s4474_s16, %s4532_s6 }
 0x5d1   : > { %p3407_p13 = scmp.lt.u32.totalorder %s3405_s29, %s3401_s17  ;;  %p3409_p6 = scmp.lt.u32.totalorder %s3401_s17, %s4474_s16 }
 0x5d2   : > { %p3403_p2 = pnand %p3402_p1, %p3620_p10 }
 0x5d3   : > { %p3408_p4 = por %p3407_p13, %p3406_p7 }
 0x5d4   : > { %p3404_p3 = pneg %p3403_p2 }
 0x5d5   : > { %p3410_p8 = por %p3409_p6, %p3408_p4 }
 0x5d7   : > { %p3411_p12 = pnand %p3410_p8, %p3404_p3 }
 0x5d9   : > { %3414 = shalt.err (!%p3411_p12)
}
 0x5da   : > { %s3484_s18 = smov 384   ;;  %s3485_s14 = smov 24  }
 0x5db   : > { %3168 = dma.vmem_to_hbm [thread:$0]  (%p3620_p10), %s4476_s28, 768, %s4474_s16, %s2647_s15, %s3484_s18, %s3484_s18, %s3485_s14  }
 0x5dc PF: > { %s2675_s24 = sand.u32 1, %s3453_s21   ;;  %p4563_p11 = scmp.ne.s32.totalorder %s4545_s8, 0 }
 0x5dd   : > { %p4564_p0 = scmp.ge.s32.totalorder %s3473_s26, 2  ;;  %s2676_s11 = scalar_lea.sflag [#allocation8], %s2675_s24 }
 0x5df   : > { %p3179_p5 = pnand %p4564_p0, %p4563_p11 }
 0x5e1   : > { %3448 = dma.done.wait (!%p3179_p5), %s2676_s11, 768  }
 0x5e2   : > { %3450 = vsyncadd (!%p3179_p5), %s2676_s11, 4294966528  ;;  %s23_s26 = sadd.s32 1, %s3473_s26   ;;  %s4565_s21 = smov %s3457_s22 }
 0x5e3   : > { %p20_p9 = scmp.ge.s32.totalorder %s23_s26, 4   ;;  %s4566_s22 = smov %s3461_s23 }
 0x5e4   : > { %s4567_s23 = smov %s3629_s20  ;;  %s4568_s24 = smov %s3469_s25 }
 0x5e5   : > { %s4569_s25 = smov %s4571_s13  ;;  %22 = sbr.rel (!%p20_p9) target bundleno = 7 (0x7), region = 110 }
 0x5ec   :  { %2681 = vsyncpa [#allocation7], 1 }
 0x5ed   :  { %2683 = vsyncpa [#allocation7 + $0x1], 1 }
 0x5ee   :  { %2684 = vsyncpa [#allocation10], 1 }
 0x5ef   :  { %2685 = vsyncpa [#allocation8], 1 }
 0x5f0   :  { %2687 = vsyncpa [#allocation8 + $0x1], 1 }

</bundles_post_ra>
